<compile_context>
chip_gen: v6e
topology: v6e:2x2x1
jax: 0.10.0
libtpu: 0.0.40
codegen_flags: <defaults>
</compile_context>

<pallas_src>
import jax
import jax.numpy as jnp
from jax.experimental import pallas as pl
from jax.experimental.pallas import tpu as pltpu


# ----------------------------------------------------------------------------
# LSTM cell math (gates pre-ordered [i, f, o, g]); f32 elementwise.
# ----------------------------------------------------------------------------
def _lstm_cell(gates, c_prev, H):
    sig = jax.nn.sigmoid(gates[:, :3 * H])        # one full-width sigmoid (i,f,o)
    i = sig[:, 0 * H:1 * H]
    f = sig[:, 1 * H:2 * H]
    o = sig[:, 2 * H:3 * H]
    g = jnp.tanh(gates[:, 3 * H:])
    c_new = f * c_prev + i * g
    h_new = o * jnp.tanh(c_new)
    return h_new, c_new


# ----------------------------------------------------------------------------
# Fused bidirectional, time-chunked, masked LSTM recurrence kernels.
# Inputs are the precomputed input projections gx = x @ W_ih + b  (f32).
# Block layout per grid step c:
#   gxf / mf / outf : forward-time chunk c
#   gxb / mb / outb : backward-time chunk nC-1-c (processed locally reversed)
# ----------------------------------------------------------------------------
def bilstm_seq_kernel(gxf_ref, gxb_ref, mf_ref, mb_ref, whhf_ref, whhb_ref,
                      outf_ref, outb_ref, h_sc, c_sc):
    c = pl.program_id(0)
    H = whhf_ref.shape[0]
    Tc = gxf_ref.shape[0]

    @pl.when(c == 0)
    def _():
        h_sc[...] = jnp.zeros_like(h_sc)
        c_sc[...] = jnp.zeros_like(c_sc)

    wf = whhf_ref[...]          # (H, 4H) bf16, hoisted out of the time loop
    wb = whhb_ref[...]

    def step(j, carry):
        hf, cf, hb, cb = carry
        # ---- forward direction, local time j ----
        gf = gxf_ref[j] + jnp.dot(hf.astype(wf.dtype), wf,
                                  preferred_element_type=jnp.float32)
        hfn, cfn = _lstm_cell(gf, cf, H)
        mf = mf_ref[j] > 0.5                                  # (B, 1) bool
        outf_ref[j] = jnp.where(mf, hfn, 0.0).astype(outf_ref.dtype)
        hf = jnp.where(mf, hfn, hf)
        cf = jnp.where(mf, cfn, cf)
        # ---- backward direction, local time Tc-1-j ----
        jb = Tc - 1 - j
        gb = gxb_ref[jb] + jnp.dot(hb.astype(wb.dtype), wb,
                                   preferred_element_type=jnp.float32)
        hbn, cbn = _lstm_cell(gb, cb, H)
        mb = mb_ref[jb] > 0.5
        outb_ref[jb] = jnp.where(mb, hbn, 0.0).astype(outb_ref.dtype)
        hb = jnp.where(mb, hbn, hb)
        cb = jnp.where(mb, cbn, cb)
        return hf, cf, hb, cb

    init = (h_sc[0], c_sc[0], h_sc[1], c_sc[1])
    hf, cf, hb, cb = jax.lax.fori_loop(0, Tc, step, init, unroll=True)
    h_sc[0] = hf
    c_sc[0] = cf
    h_sc[1] = hb
    c_sc[1] = cb


def bilstm_final_kernel(gxf_ref, gxb_ref, mf_ref, mb_ref, whhf_ref, whhb_ref,
                        hN_ref, h_sc, c_sc):
    c = pl.program_id(0)
    H = whhf_ref.shape[0]
    Tc = gxf_ref.shape[0]

    @pl.when(c == 0)
    def _():
        h_sc[...] = jnp.zeros_like(h_sc)
        c_sc[...] = jnp.zeros_like(c_sc)

    wf = whhf_ref[...]
    wb = whhb_ref[...]

    def step(j, carry):
        hf, cf, hb, cb = carry
        gf = gxf_ref[j] + jnp.dot(hf.astype(wf.dtype), wf,
                                  preferred_element_type=jnp.float32)
        hfn, cfn = _lstm_cell(gf, cf, H)
        mf = mf_ref[j] > 0.5
        hf = jnp.where(mf, hfn, hf)
        cf = jnp.where(mf, cfn, cf)
        jb = Tc - 1 - j
        gb = gxb_ref[jb] + jnp.dot(hb.astype(wb.dtype), wb,
                                   preferred_element_type=jnp.float32)
        hbn, cbn = _lstm_cell(gb, cb, H)
        mb = mb_ref[jb] > 0.5
        hb = jnp.where(mb, hbn, hb)
        cb = jnp.where(mb, cbn, cb)
        return hf, cf, hb, cb

    init = (h_sc[0], c_sc[0], h_sc[1], c_sc[1])
    hf, cf, hb, cb = jax.lax.fori_loop(0, Tc, step, init, unroll=True)
    h_sc[0] = hf
    c_sc[0] = cf
    h_sc[1] = hb
    c_sc[1] = cb

    # Final hidden only (CharLSTM); output block index is constant so the HBM
    # writeback happens once at the end of the grid.
    hN_ref[:, :H] = hf.astype(hN_ref.dtype)
    hN_ref[:, H:] = hb.astype(hN_ref.dtype)


# ----------------------------------------------------------------------------
# Wrapper: weight prep, hoisted input projection, chunked pallas_call.
# ----------------------------------------------------------------------------
def _reorder_ifgo_to_ifog(w):
    """PyTorch LSTM gate order [i,f,g,o] -> kernel order [i,f,o,g]."""
    i, f, g, o = jnp.split(w, 4, axis=-1)
    return jnp.concatenate([i, f, o, g], axis=-1)


def _prep_lstm(p):
    return dict(
        wih=_reorder_ifgo_to_ifog(p["wih"]),                     # (D, 4H) f32
        whh=_reorder_ifgo_to_ifog(p["whh"]).astype(jnp.bfloat16),  # (H, 4H) bf16
        b=_reorder_ifgo_to_ifog(p["b"]),                         # (4H,)  f32
    )


def run_bilstm(x, m, p_fw, p_bw, *, chunk=16, outputs="sequence"):
    """x: (T, B, D) time-major f32, m: (T, B, 1) float {0,1} mask.
    outputs="sequence" -> (T, B, 2H); outputs="final" -> (B, 2H)."""
    T, B, _ = x.shape
    pf = _prep_lstm(p_fw)
    pb = _prep_lstm(p_bw)
    H = pf["whh"].shape[0]

    # Hoisted input projection: one big MXU-friendly matmul per direction
    # (bf16 inputs, f32 accumulation). The serial loop only sees h @ W_hh.
    xb = x.astype(jnp.bfloat16)
    gx_f = jnp.einsum("tbd,dg->tbg", xb, pf["wih"].astype(jnp.bfloat16),
                      preferred_element_type=jnp.float32) + pf["b"]
    gx_b = jnp.einsum("tbd,dg->tbg", xb, pb["wih"].astype(jnp.bfloat16),
                      preferred_element_type=jnp.float32) + pb["b"]

    # Chunk the time axis; pad with mask=0 steps (state frozen, output zero).
    Tc = min(chunk, T)
    Tp = ((T + Tc - 1) // Tc) * Tc
    if Tp != T:
        pad = ((0, Tp - T), (0, 0), (0, 0))
        gx_f = jnp.pad(gx_f, pad)
        gx_b = jnp.pad(gx_b, pad)
        m = jnp.pad(m, pad)
    nC = Tp // Tc

    in_specs = [
        pl.BlockSpec((Tc, B, 4 * H), lambda c: (c, 0, 0)),           # gx fwd
        pl.BlockSpec((Tc, B, 4 * H), lambda c: (nC - 1 - c, 0, 0)),  # gx bwd
        pl.BlockSpec((Tc, B, 1), lambda c: (c, 0, 0)),               # mask fwd
        pl.BlockSpec((Tc, B, 1), lambda c: (nC - 1 - c, 0, 0)),      # mask bwd
        pl.BlockSpec((H, 4 * H), lambda c: (0, 0)),                  # W_hh fwd
        pl.BlockSpec((H, 4 * H), lambda c: (0, 0)),                  # W_hh bwd
    ]
    scratch = [pltpu.VMEM((2, B, H), jnp.float32),                   # h (fwd,bwd)
               pltpu.VMEM((2, B, H), jnp.float32)]                   # c (fwd,bwd)

    if outputs == "sequence":
        kernel = bilstm_seq_kernel
        out_shape = (jax.ShapeDtypeStruct((Tp, B, H), jnp.float32),
                     jax.ShapeDtypeStruct((Tp, B, H), jnp.float32))
        out_specs = [pl.BlockSpec((Tc, B, H), lambda c: (c, 0, 0)),
                     pl.BlockSpec((Tc, B, H), lambda c: (nC - 1 - c, 0, 0))]
    else:
        kernel = bilstm_final_kernel
        out_shape = jax.ShapeDtypeStruct((B, 2 * H), jnp.float32)
        out_specs = pl.BlockSpec((B, 2 * H), lambda c: (0, 0))

    res = pl.pallas_call(
        kernel,
        out_shape=out_shape,
        grid_spec=pltpu.PrefetchScalarGridSpec(
            num_scalar_prefetch=0,
            grid=(nC,),
            in_specs=in_specs,
            out_specs=out_specs,
            scratch_shapes=scratch,
        ),
        compiler_params=pltpu.CompilerParams(
            dimension_semantics=("arbitrary",)),     # serial recurrence over time
    )(gx_f, gx_b, m, m, pf["whh"], pb["whh"])

    if outputs == "sequence":
        out_f, out_b = res
        return jnp.concatenate([out_f[:T], out_b[:T]], axis=-1)      # (T, B, 2H)
    return res                                                       # (B, 2H)


# ----------------------------------------------------------------------------
# "represent" kernel, tiled over the batch; halves written directly.
#   forward_minus  = fwd[:, 1:-1] - fwd[:, :-2]
#   backward_minus = bwd[:, 1:-1] - bwd[:, 2:]
# ----------------------------------------------------------------------------
def represent_kernel(x_ref, o_ref):
    H = x_ref.shape[-1] // 2
    x = x_ref[...]                                   # (1, L, 2H) block
    o_ref[:, :, :H] = x[:, 1:-1, :H] - x[:, :-2, :H]
    o_ref[:, :, H:] = x[:, 1:-1, H:] - x[:, 2:, H:]


def run_represent(x):
    B, L, HH = x.shape
    return pl.pallas_call(
        represent_kernel,
        out_shape=jax.ShapeDtypeStruct((B, L - 2, HH), jnp.float32),
        grid_spec=pltpu.PrefetchScalarGridSpec(
            num_scalar_prefetch=0,
            grid=(B,),
            in_specs=[pl.BlockSpec((1, L, HH), lambda b: (b, 0, 0))],
            out_specs=pl.BlockSpec((1, L - 2, HH), lambda b: (b, 0, 0)),
        ),
        compiler_params=pltpu.CompilerParams(dimension_semantics=("parallel",)),
    )(x)


# ----------------------------------------------------------------------------
# Parameter init (deterministic, synthetic). PyTorch conventions:
# wih (D, 4H), whh (H, 4H), b = b_ih + b_hh, gate order [i, f, g, o].
# ----------------------------------------------------------------------------
def _normal(key, shape, scale=0.1):
    return scale * jax.random.normal(key, shape, dtype=jnp.float32)


def init_lstm_params(key, d_in, hidden):
    k1, k2, k3 = jax.random.split(key, 3)
    return dict(
        wih=_normal(k1, (d_in, 4 * hidden)),
        whh=_normal(k2, (hidden, 4 * hidden)),
        b=_normal(k3, (4 * hidden,)),
    )


def init_params(key, n_words, n_embed, n_chars, n_char_embed,
                n_char_lstm_embed, n_layers, n_hidden):
    keys = jax.random.split(key, 4 + 2 * n_layers)
    hc = n_char_lstm_embed // 2                      # CharLSTM hidden per direction
    params = {
        "word_embed": _normal(keys[0], (n_words, n_embed)),
        "char_embed": _normal(keys[1], (n_chars, n_char_embed)),
        "char_fw": init_lstm_params(keys[2], n_char_embed, hc),
        "char_bw": init_lstm_params(keys[3], n_char_embed, hc),
        "layers": [],
    }
    d = n_embed + n_char_lstm_embed
    for l in range(n_layers):
        params["layers"].append({
            "fw": init_lstm_params(keys[4 + 2 * l], d, n_hidden),
            "bw": init_lstm_params(keys[5 + 2 * l], d, n_hidden),
        })
        d = 2 * n_hidden
    return params


# ----------------------------------------------------------------------------
# LSTMEncoder.forward
# ----------------------------------------------------------------------------
def lstm_encoder_forward(params, words, chars, pad_index=0):
    B, L = words.shape
    fix = chars.shape[-1]
    mask = (words != pad_index)                                   # (B, L)

    # nn.Embedding lookups (glue; gather stays in plain JAX).
    word_embed = jnp.take(params["word_embed"], words, axis=0)    # (B, L, E)

    # CharLSTM: 1-layer BiLSTM over characters of each word, final hiddens only.
    char_mask = (chars != pad_index)                              # (B, L, fix)
    ce = jnp.take(params["char_embed"], chars, axis=0)            # (B, L, fix, Ec)
    ce_t = ce.reshape(B * L, fix, -1).transpose(1, 0, 2)          # (fix, B*L, Ec)
    cm_t = char_mask.reshape(B * L, fix).T[:, :, None].astype(jnp.float32)
    char_h = run_bilstm(ce_t, cm_t, params["char_fw"], params["char_bw"],
                        outputs="final")                          # (B*L, 2*hc)
    # words with zero chars end up with all-zero hidden (masked_scatter equiv).
    char_embed = char_h.reshape(B, L, -1)

    # IndependentDropout(p=0) -> identity.
    embed = jnp.concatenate([word_embed, char_embed], axis=-1)    # (B, L, E+Ec2)

    # Stacked BiLSTM over the (masked) word sequence, fwd+bwd fused per layer.
    x = embed.transpose(1, 0, 2)                                  # (L, B, D)
    m = mask.T[:, :, None].astype(jnp.float32)                    # (L, B, 1)
    for layer in params["layers"]:
        x = run_bilstm(x, m, layer["fw"], layer["bw"], outputs="sequence")
    out = x.transpose(1, 0, 2)                                    # (B, L, 2H)

    # SharedDropout(p=0) -> identity; then chunk/diff/concat kernel.
    return run_represent(out)                                     # (B, L-2, 2H)


# ----------------------------------------------------------------------------
if __name__ == "__main__":
    # Module hyper-parameters (small).
    n_words, n_embed = 100, 32
    n_chars, n_char_embed, n_char_lstm_embed = 30, 16, 32
    n_layers, n_hidden = 2, 32
    B, L, FIX = 2, 8, 4

    key = jax.random.PRNGKey(0)
    pkey, wkey, ckey = jax.random.split(key, 3)
    params = init_params(pkey, n_words, n_embed, n_chars, n_char_embed,
                         n_char_lstm_embed, n_layers, n_hidden)

    # Deterministic example inputs with some padding to exercise the mask path.
    words = jax.random.randint(wkey, (B, L), 1, n_words, dtype=jnp.int32)
    words = words.at[1, 6:].set(0)                        # seq 1 has length 6
    chars = jax.random.randint(ckey, (B, L, FIX), 1, n_chars, dtype=jnp.int32)
    chars = chars.at[:, :, FIX - 1].set(0)                # trailing pad char
    chars = jnp.where(words[:, :, None] == 0, 0, chars)   # pad words -> pad chars

    represent = jax.block_until_ready(lstm_encoder_forward(params, words, chars))
    assert represent.shape == (B, L - 2, 2 * n_hidden), represent.shape
    assert bool(jnp.all(jnp.isfinite(represent)))
    print("KERNEL_OK")
</pallas_src>

<mosaic_0001>
module attributes {stable_mosaic.version = 11 : i64} {
  func.func @bilstm_final_kernel(%arg0: i32, %arg1: memref<4x16x64xf32, #tpu.memory_space<vmem>>, %arg2: memref<4x16x64xf32, #tpu.memory_space<vmem>>, %arg3: memref<4x16x1xf32, #tpu.memory_space<vmem>>, %arg4: memref<4x16x1xf32, #tpu.memory_space<vmem>>, %arg5: memref<16x64xbf16, #tpu.memory_space<vmem>>, %arg6: memref<16x64xbf16, #tpu.memory_space<vmem>>, %arg7: memref<16x32xf32, #tpu.memory_space<vmem>>, %arg8: memref<2x16x16xf32, #tpu.memory_space<vmem>>, %arg9: memref<2x16x16xf32, #tpu.memory_space<vmem>>) attributes {dimension_semantics = [#tpu.dimension_semantics<arbitrary>], iteration_bounds = array<i64: 1>, scalar_prefetch = 0 : i64, scratch_operands = 2 : i64, tpu.core_type = #tpu.core_type<tc>, window_params = [{transform_indices = @transform_0, window_bounds = array<i64: 4, 16, 64>}, {transform_indices = @transform_1, window_bounds = array<i64: 4, 16, 64>}, {transform_indices = @transform_2, window_bounds = array<i64: 4, 16, 1>}, {transform_indices = @transform_3, window_bounds = array<i64: 4, 16, 1>}, {pipeline_mode = #tpu.pipeline_mode<synchronous>, transform_indices = @transform_4, window_bounds = array<i64: 16, 64>}, {pipeline_mode = #tpu.pipeline_mode<synchronous>, transform_indices = @transform_5, window_bounds = array<i64: 16, 64>}, {pipeline_mode = #tpu.pipeline_mode<synchronous>, transform_indices = @transform_6, window_bounds = array<i64: 16, 32>}]} {
    %c0_i32 = arith.constant 0 : i32
    %0 = arith.cmpi eq, %arg0, %c0_i32 : i32
    %1 = arith.extui %0 : i1 to i32
    %c0_i32_0 = arith.constant 0 : i32
    %2 = arith.cmpi ne, %1, %c0_i32_0 : i32
    scf.if %2 {
      %cst_90 = arith.constant 0.000000e+00 : f32
      %295 = vector.broadcast %cst_90 : f32 to vector<2x16x16xf32>
      %c0_91 = arith.constant 0 : index
      %c0_92 = arith.constant 0 : index
      %c0_93 = arith.constant 0 : index
      %296 = vector.load %arg8[%c0_91, %c0_92, %c0_93] : memref<2x16x16xf32, #tpu.memory_space<vmem>>, vector<2x16x16xf32>
      tpu.vector_store %arg8[%c0_91, %c0_92, %c0_93], %295 {strides = array<i32>} : memref<2x16x16xf32, #tpu.memory_space<vmem>>, vector<2x16x16xf32>,
      %cst_94 = arith.constant 0.000000e+00 : f32
      %297 = vector.broadcast %cst_94 : f32 to vector<2x16x16xf32>
      %c0_95 = arith.constant 0 : index
      %c0_96 = arith.constant 0 : index
      %c0_97 = arith.constant 0 : index
      %298 = vector.load %arg9[%c0_95, %c0_96, %c0_97] : memref<2x16x16xf32, #tpu.memory_space<vmem>>, vector<2x16x16xf32>
      tpu.vector_store %arg9[%c0_95, %c0_96, %c0_97], %297 {strides = array<i32>} : memref<2x16x16xf32, #tpu.memory_space<vmem>>, vector<2x16x16xf32>,
    } else {
    }
    %c0 = arith.constant 0 : index
    %c0_1 = arith.constant 0 : index
    %3 = vector.load %arg5[%c0, %c0_1] : memref<16x64xbf16, #tpu.memory_space<vmem>>, vector<16x64xbf16>
    %c0_2 = arith.constant 0 : index
    %c0_3 = arith.constant 0 : index
    %4 = vector.load %arg6[%c0_2, %c0_3] : memref<16x64xbf16, #tpu.memory_space<vmem>>, vector<16x64xbf16>
    %c0_4 = arith.constant 0 : index
    %c0_5 = arith.constant 0 : index
    %c0_6 = arith.constant 0 : index
    %5 = vector.load %arg8[%c0_4, %c0_5, %c0_6] : memref<2x16x16xf32, #tpu.memory_space<vmem>>, vector<1x16x16xf32>
    %6 = vector.shape_cast %5 : vector<1x16x16xf32> to vector<16x16xf32>
    %c0_7 = arith.constant 0 : index
    %c0_8 = arith.constant 0 : index
    %c0_9 = arith.constant 0 : index
    %7 = vector.load %arg9[%c0_7, %c0_8, %c0_9] : memref<2x16x16xf32, #tpu.memory_space<vmem>>, vector<1x16x16xf32>
    %8 = vector.shape_cast %7 : vector<1x16x16xf32> to vector<16x16xf32>
    %c1 = arith.constant 1 : index
    %c0_10 = arith.constant 0 : index
    %c0_11 = arith.constant 0 : index
    %9 = vector.load %arg8[%c1, %c0_10, %c0_11] : memref<2x16x16xf32, #tpu.memory_space<vmem>>, vector<1x16x16xf32>
    %10 = vector.shape_cast %9 : vector<1x16x16xf32> to vector<16x16xf32>
    %c1_12 = arith.constant 1 : index
    %c0_13 = arith.constant 0 : index
    %c0_14 = arith.constant 0 : index
    %11 = vector.load %arg9[%c1_12, %c0_13, %c0_14] : memref<2x16x16xf32, #tpu.memory_space<vmem>>, vector<1x16x16xf32>
    %12 = vector.shape_cast %11 : vector<1x16x16xf32> to vector<16x16xf32>
    %c0_i32_15 = arith.constant 0 : i32
    %13 = arith.index_cast %c0_i32_15 : i32 to index
    %c0_16 = arith.constant 0 : index
    %c0_17 = arith.constant 0 : index
    %14 = vector.load %arg1[%13, %c0_16, %c0_17] : memref<4x16x64xf32, #tpu.memory_space<vmem>>, vector<1x16x64xf32>
    %15 = vector.shape_cast %14 : vector<1x16x64xf32> to vector<16x64xf32>
    %16 = arith.truncf %6 : vector<16x16xf32> to vector<16x16xbf16>
    %cst = arith.constant dense<0.000000e+00> : vector<16x64xf32>
    %17 = tpu.matmul %16, %3, %cst {dimension_numbers = #tpu.dot_dimension_numbers<[1], [0], [0], [1], [0, 0, 1, 1], [], []>} : vector<16x16xbf16>, vector<16x64xbf16>, vector<16x64xf32> -> vector<16x64xf32>
    %18 = arith.addf %15, %17 : vector<16x64xf32>
    %19 = vector.extract_strided_slice %18 {offsets = [0, 0], sizes = [16, 48], strides = [1, 1]} : vector<16x64xf32> to vector<16x48xf32>
    %20 = arith.negf %19 : vector<16x48xf32>
    %21 = math.exp %20 : vector<16x48xf32>
    %cst_18 = arith.constant 1.000000e+00 : f32
    %22 = vector.broadcast %cst_18 : f32 to vector<16x48xf32>
    %23 = arith.addf %22, %21 : vector<16x48xf32>
    %24 = arith.divf %22, %23 : vector<16x48xf32>
    %25 = vector.extract_strided_slice %24 {offsets = [0, 0], sizes = [16, 16], strides = [1, 1]} : vector<16x48xf32> to vector<16x16xf32>
    %26 = vector.extract_strided_slice %24 {offsets = [0, 16], sizes = [16, 16], strides = [1, 1]} : vector<16x48xf32> to vector<16x16xf32>
    %27 = vector.extract_strided_slice %24 {offsets = [0, 32], sizes = [16, 16], strides = [1, 1]} : vector<16x48xf32> to vector<16x16xf32>
    %28 = vector.extract_strided_slice %18 {offsets = [0, 48], sizes = [16, 16], strides = [1, 1]} : vector<16x64xf32> to vector<16x16xf32>
    %29 = math.tanh %28 : vector<16x16xf32>
    %30 = arith.mulf %26, %8 : vector<16x16xf32>
    %31 = arith.mulf %25, %29 : vector<16x16xf32>
    %32 = arith.addf %30, %31 : vector<16x16xf32>
    %33 = math.tanh %32 : vector<16x16xf32>
    %34 = arith.mulf %27, %33 : vector<16x16xf32>
    %35 = arith.index_cast %c0_i32_15 : i32 to index
    %c0_19 = arith.constant 0 : index
    %c0_20 = arith.constant 0 : index
    %36 = vector.load %arg3[%35, %c0_19, %c0_20] : memref<4x16x1xf32, #tpu.memory_space<vmem>>, vector<1x16x1xf32>
    %37 = vector.shape_cast %36 : vector<1x16x1xf32> to vector<16x1xf32>
    %cst_21 = arith.constant 5.000000e-01 : f32
    %38 = vector.broadcast %cst_21 : f32 to vector<16x1xf32>
    %39 = arith.cmpf ogt, %37, %38 : vector<16x1xf32>
    %40 = vector.shape_cast %39 : vector<16x1xi1> to vector<16x1xi1>
    %41 = vector.broadcast %40 : vector<16x1xi1> to vector<16x16xi1>
    %42 = arith.select %41, %34, %6 : vector<16x16xi1>, vector<16x16xf32>
    %43 = vector.shape_cast %39 : vector<16x1xi1> to vector<16x1xi1>
    %44 = vector.broadcast %43 : vector<16x1xi1> to vector<16x16xi1>
    %45 = arith.select %44, %32, %8 : vector<16x16xi1>, vector<16x16xf32>
    %c3_i32 = arith.constant 3 : i32
    %46 = arith.subi %c3_i32, %c0_i32_15 : i32
    %47 = arith.index_cast %46 : i32 to index
    %c0_22 = arith.constant 0 : index
    %c0_23 = arith.constant 0 : index
    %48 = vector.load %arg2[%47, %c0_22, %c0_23] : memref<4x16x64xf32, #tpu.memory_space<vmem>>, vector<1x16x64xf32>
    %49 = vector.shape_cast %48 : vector<1x16x64xf32> to vector<16x64xf32>
    %50 = arith.truncf %10 : vector<16x16xf32> to vector<16x16xbf16>
    %cst_24 = arith.constant dense<0.000000e+00> : vector<16x64xf32>
    %51 = tpu.matmul %50, %4, %cst_24 {dimension_numbers = #tpu.dot_dimension_numbers<[1], [0], [0], [1], [0, 0, 1, 1], [], []>} : vector<16x16xbf16>, vector<16x64xbf16>, vector<16x64xf32> -> vector<16x64xf32>
    %52 = arith.addf %49, %51 : vector<16x64xf32>
    %53 = vector.extract_strided_slice %52 {offsets = [0, 0], sizes = [16, 48], strides = [1, 1]} : vector<16x64xf32> to vector<16x48xf32>
    %54 = arith.negf %53 : vector<16x48xf32>
    %55 = math.exp %54 : vector<16x48xf32>
    %cst_25 = arith.constant 1.000000e+00 : f32
    %56 = vector.broadcast %cst_25 : f32 to vector<16x48xf32>
    %57 = arith.addf %56, %55 : vector<16x48xf32>
    %58 = arith.divf %56, %57 : vector<16x48xf32>
    %59 = vector.extract_strided_slice %58 {offsets = [0, 0], sizes = [16, 16], strides = [1, 1]} : vector<16x48xf32> to vector<16x16xf32>
    %60 = vector.extract_strided_slice %58 {offsets = [0, 16], sizes = [16, 16], strides = [1, 1]} : vector<16x48xf32> to vector<16x16xf32>
    %61 = vector.extract_strided_slice %58 {offsets = [0, 32], sizes = [16, 16], strides = [1, 1]} : vector<16x48xf32> to vector<16x16xf32>
    %62 = vector.extract_strided_slice %52 {offsets = [0, 48], sizes = [16, 16], strides = [1, 1]} : vector<16x64xf32> to vector<16x16xf32>
    %63 = math.tanh %62 : vector<16x16xf32>
    %64 = arith.mulf %60, %12 : vector<16x16xf32>
    %65 = arith.mulf %59, %63 : vector<16x16xf32>
    %66 = arith.addf %64, %65 : vector<16x16xf32>
    %67 = math.tanh %66 : vector<16x16xf32>
    %68 = arith.mulf %61, %67 : vector<16x16xf32>
    %69 = arith.index_cast %46 : i32 to index
    %c0_26 = arith.constant 0 : index
    %c0_27 = arith.constant 0 : index
    %70 = vector.load %arg4[%69, %c0_26, %c0_27] : memref<4x16x1xf32, #tpu.memory_space<vmem>>, vector<1x16x1xf32>
    %71 = vector.shape_cast %70 : vector<1x16x1xf32> to vector<16x1xf32>
    %cst_28 = arith.constant 5.000000e-01 : f32
    %72 = vector.broadcast %cst_28 : f32 to vector<16x1xf32>
    %73 = arith.cmpf ogt, %71, %72 : vector<16x1xf32>
    %74 = vector.shape_cast %73 : vector<16x1xi1> to vector<16x1xi1>
    %75 = vector.broadcast %74 : vector<16x1xi1> to vector<16x16xi1>
    %76 = arith.select %75, %68, %10 : vector<16x16xi1>, vector<16x16xf32>
    %77 = vector.shape_cast %73 : vector<16x1xi1> to vector<16x1xi1>
    %78 = vector.broadcast %77 : vector<16x1xi1> to vector<16x16xi1>
    %79 = arith.select %78, %66, %12 : vector<16x16xi1>, vector<16x16xf32>
    %c1_i32 = arith.constant 1 : i32
    %80 = arith.index_cast %c1_i32 : i32 to index
    %c0_29 = arith.constant 0 : index
    %c0_30 = arith.constant 0 : index
    %81 = vector.load %arg1[%80, %c0_29, %c0_30] : memref<4x16x64xf32, #tpu.memory_space<vmem>>, vector<1x16x64xf32>
    %82 = vector.shape_cast %81 : vector<1x16x64xf32> to vector<16x64xf32>
    %83 = arith.truncf %42 : vector<16x16xf32> to vector<16x16xbf16>
    %cst_31 = arith.constant dense<0.000000e+00> : vector<16x64xf32>
    %84 = tpu.matmul %83, %3, %cst_31 {dimension_numbers = #tpu.dot_dimension_numbers<[1], [0], [0], [1], [0, 0, 1, 1], [], []>} : vector<16x16xbf16>, vector<16x64xbf16>, vector<16x64xf32> -> vector<16x64xf32>
    %85 = arith.addf %82, %84 : vector<16x64xf32>
    %86 = vector.extract_strided_slice %85 {offsets = [0, 0], sizes = [16, 48], strides = [1, 1]} : vector<16x64xf32> to vector<16x48xf32>
    %87 = arith.negf %86 : vector<16x48xf32>
    %88 = math.exp %87 : vector<16x48xf32>
    %cst_32 = arith.constant 1.000000e+00 : f32
    %89 = vector.broadcast %cst_32 : f32 to vector<16x48xf32>
    %90 = arith.addf %89, %88 : vector<16x48xf32>
    %91 = arith.divf %89, %90 : vector<16x48xf32>
    %92 = vector.extract_strided_slice %91 {offsets = [0, 0], sizes = [16, 16], strides = [1, 1]} : vector<16x48xf32> to vector<16x16xf32>
    %93 = vector.extract_strided_slice %91 {offsets = [0, 16], sizes = [16, 16], strides = [1, 1]} : vector<16x48xf32> to vector<16x16xf32>
    %94 = vector.extract_strided_slice %91 {offsets = [0, 32], sizes = [16, 16], strides = [1, 1]} : vector<16x48xf32> to vector<16x16xf32>
    %95 = vector.extract_strided_slice %85 {offsets = [0, 48], sizes = [16, 16], strides = [1, 1]} : vector<16x64xf32> to vector<16x16xf32>
    %96 = math.tanh %95 : vector<16x16xf32>
    %97 = arith.mulf %93, %45 : vector<16x16xf32>
    %98 = arith.mulf %92, %96 : vector<16x16xf32>
    %99 = arith.addf %97, %98 : vector<16x16xf32>
    %100 = math.tanh %99 : vector<16x16xf32>
    %101 = arith.mulf %94, %100 : vector<16x16xf32>
    %102 = arith.index_cast %c1_i32 : i32 to index
    %c0_33 = arith.constant 0 : index
    %c0_34 = arith.constant 0 : index
    %103 = vector.load %arg3[%102, %c0_33, %c0_34] : memref<4x16x1xf32, #tpu.memory_space<vmem>>, vector<1x16x1xf32>
    %104 = vector.shape_cast %103 : vector<1x16x1xf32> to vector<16x1xf32>
    %cst_35 = arith.constant 5.000000e-01 : f32
    %105 = vector.broadcast %cst_35 : f32 to vector<16x1xf32>
    %106 = arith.cmpf ogt, %104, %105 : vector<16x1xf32>
    %107 = vector.shape_cast %106 : vector<16x1xi1> to vector<16x1xi1>
    %108 = vector.broadcast %107 : vector<16x1xi1> to vector<16x16xi1>
    %109 = arith.select %108, %101, %42 : vector<16x16xi1>, vector<16x16xf32>
    %110 = vector.shape_cast %106 : vector<16x1xi1> to vector<16x1xi1>
    %111 = vector.broadcast %110 : vector<16x1xi1> to vector<16x16xi1>
    %112 = arith.select %111, %99, %45 : vector<16x16xi1>, vector<16x16xf32>
    %c3_i32_36 = arith.constant 3 : i32
    %113 = arith.subi %c3_i32_36, %c1_i32 : i32
    %114 = arith.index_cast %113 : i32 to index
    %c0_37 = arith.constant 0 : index
    %c0_38 = arith.constant 0 : index
    %115 = vector.load %arg2[%114, %c0_37, %c0_38] : memref<4x16x64xf32, #tpu.memory_space<vmem>>, vector<1x16x64xf32>
    %116 = vector.shape_cast %115 : vector<1x16x64xf32> to vector<16x64xf32>
    %117 = arith.truncf %76 : vector<16x16xf32> to vector<16x16xbf16>
    %cst_39 = arith.constant dense<0.000000e+00> : vector<16x64xf32>
    %118 = tpu.matmul %117, %4, %cst_39 {dimension_numbers = #tpu.dot_dimension_numbers<[1], [0], [0], [1], [0, 0, 1, 1], [], []>} : vector<16x16xbf16>, vector<16x64xbf16>, vector<16x64xf32> -> vector<16x64xf32>
    %119 = arith.addf %116, %118 : vector<16x64xf32>
    %120 = vector.extract_strided_slice %119 {offsets = [0, 0], sizes = [16, 48], strides = [1, 1]} : vector<16x64xf32> to vector<16x48xf32>
    %121 = arith.negf %120 : vector<16x48xf32>
    %122 = math.exp %121 : vector<16x48xf32>
    %cst_40 = arith.constant 1.000000e+00 : f32
    %123 = vector.broadcast %cst_40 : f32 to vector<16x48xf32>
    %124 = arith.addf %123, %122 : vector<16x48xf32>
    %125 = arith.divf %123, %124 : vector<16x48xf32>
    %126 = vector.extract_strided_slice %125 {offsets = [0, 0], sizes = [16, 16], strides = [1, 1]} : vector<16x48xf32> to vector<16x16xf32>
    %127 = vector.extract_strided_slice %125 {offsets = [0, 16], sizes = [16, 16], strides = [1, 1]} : vector<16x48xf32> to vector<16x16xf32>
    %128 = vector.extract_strided_slice %125 {offsets = [0, 32], sizes = [16, 16], strides = [1, 1]} : vector<16x48xf32> to vector<16x16xf32>
    %129 = vector.extract_strided_slice %119 {offsets = [0, 48], sizes = [16, 16], strides = [1, 1]} : vector<16x64xf32> to vector<16x16xf32>
    %130 = math.tanh %129 : vector<16x16xf32>
    %131 = arith.mulf %127, %79 : vector<16x16xf32>
    %132 = arith.mulf %126, %130 : vector<16x16xf32>
    %133 = arith.addf %131, %132 : vector<16x16xf32>
    %134 = math.tanh %133 : vector<16x16xf32>
    %135 = arith.mulf %128, %134 : vector<16x16xf32>
    %136 = arith.index_cast %113 : i32 to index
    %c0_41 = arith.constant 0 : index
    %c0_42 = arith.constant 0 : index
    %137 = vector.load %arg4[%136, %c0_41, %c0_42] : memref<4x16x1xf32, #tpu.memory_space<vmem>>, vector<1x16x1xf32>
    %138 = vector.shape_cast %137 : vector<1x16x1xf32> to vector<16x1xf32>
    %cst_43 = arith.constant 5.000000e-01 : f32
    %139 = vector.broadcast %cst_43 : f32 to vector<16x1xf32>
    %140 = arith.cmpf ogt, %138, %139 : vector<16x1xf32>
    %141 = vector.shape_cast %140 : vector<16x1xi1> to vector<16x1xi1>
    %142 = vector.broadcast %141 : vector<16x1xi1> to vector<16x16xi1>
    %143 = arith.select %142, %135, %76 : vector<16x16xi1>, vector<16x16xf32>
    %144 = vector.shape_cast %140 : vector<16x1xi1> to vector<16x1xi1>
    %145 = vector.broadcast %144 : vector<16x1xi1> to vector<16x16xi1>
    %146 = arith.select %145, %133, %79 : vector<16x16xi1>, vector<16x16xf32>
    %c2_i32 = arith.constant 2 : i32
    %147 = arith.index_cast %c2_i32 : i32 to index
    %c0_44 = arith.constant 0 : index
    %c0_45 = arith.constant 0 : index
    %148 = vector.load %arg1[%147, %c0_44, %c0_45] : memref<4x16x64xf32, #tpu.memory_space<vmem>>, vector<1x16x64xf32>
    %149 = vector.shape_cast %148 : vector<1x16x64xf32> to vector<16x64xf32>
    %150 = arith.truncf %109 : vector<16x16xf32> to vector<16x16xbf16>
    %cst_46 = arith.constant dense<0.000000e+00> : vector<16x64xf32>
    %151 = tpu.matmul %150, %3, %cst_46 {dimension_numbers = #tpu.dot_dimension_numbers<[1], [0], [0], [1], [0, 0, 1, 1], [], []>} : vector<16x16xbf16>, vector<16x64xbf16>, vector<16x64xf32> -> vector<16x64xf32>
    %152 = arith.addf %149, %151 : vector<16x64xf32>
    %153 = vector.extract_strided_slice %152 {offsets = [0, 0], sizes = [16, 48], strides = [1, 1]} : vector<16x64xf32> to vector<16x48xf32>
    %154 = arith.negf %153 : vector<16x48xf32>
    %155 = math.exp %154 : vector<16x48xf32>
    %cst_47 = arith.constant 1.000000e+00 : f32
    %156 = vector.broadcast %cst_47 : f32 to vector<16x48xf32>
    %157 = arith.addf %156, %155 : vector<16x48xf32>
    %158 = arith.divf %156, %157 : vector<16x48xf32>
    %159 = vector.extract_strided_slice %158 {offsets = [0, 0], sizes = [16, 16], strides = [1, 1]} : vector<16x48xf32> to vector<16x16xf32>
    %160 = vector.extract_strided_slice %158 {offsets = [0, 16], sizes = [16, 16], strides = [1, 1]} : vector<16x48xf32> to vector<16x16xf32>
    %161 = vector.extract_strided_slice %158 {offsets = [0, 32], sizes = [16, 16], strides = [1, 1]} : vector<16x48xf32> to vector<16x16xf32>
    %162 = vector.extract_strided_slice %152 {offsets = [0, 48], sizes = [16, 16], strides = [1, 1]} : vector<16x64xf32> to vector<16x16xf32>
    %163 = math.tanh %162 : vector<16x16xf32>
    %164 = arith.mulf %160, %112 : vector<16x16xf32>
    %165 = arith.mulf %159, %163 : vector<16x16xf32>
    %166 = arith.addf %164, %165 : vector<16x16xf32>
    %167 = math.tanh %166 : vector<16x16xf32>
    %168 = arith.mulf %161, %167 : vector<16x16xf32>
    %169 = arith.index_cast %c2_i32 : i32 to index
    %c0_48 = arith.constant 0 : index
    %c0_49 = arith.constant 0 : index
    %170 = vector.load %arg3[%169, %c0_48, %c0_49] : memref<4x16x1xf32, #tpu.memory_space<vmem>>, vector<1x16x1xf32>
    %171 = vector.shape_cast %170 : vector<1x16x1xf32> to vector<16x1xf32>
    %cst_50 = arith.constant 5.000000e-01 : f32
    %172 = vector.broadcast %cst_50 : f32 to vector<16x1xf32>
    %173 = arith.cmpf ogt, %171, %172 : vector<16x1xf32>
    %174 = vector.shape_cast %173 : vector<16x1xi1> to vector<16x1xi1>
    %175 = vector.broadcast %174 : vector<16x1xi1> to vector<16x16xi1>
    %176 = arith.select %175, %168, %109 : vector<16x16xi1>, vector<16x16xf32>
    %177 = vector.shape_cast %173 : vector<16x1xi1> to vector<16x1xi1>
    %178 = vector.broadcast %177 : vector<16x1xi1> to vector<16x16xi1>
    %179 = arith.select %178, %166, %112 : vector<16x16xi1>, vector<16x16xf32>
    %c3_i32_51 = arith.constant 3 : i32
    %180 = arith.subi %c3_i32_51, %c2_i32 : i32
    %181 = arith.index_cast %180 : i32 to index
    %c0_52 = arith.constant 0 : index
    %c0_53 = arith.constant 0 : index
    %182 = vector.load %arg2[%181, %c0_52, %c0_53] : memref<4x16x64xf32, #tpu.memory_space<vmem>>, vector<1x16x64xf32>
    %183 = vector.shape_cast %182 : vector<1x16x64xf32> to vector<16x64xf32>
    %184 = arith.truncf %143 : vector<16x16xf32> to vector<16x16xbf16>
    %cst_54 = arith.constant dense<0.000000e+00> : vector<16x64xf32>
    %185 = tpu.matmul %184, %4, %cst_54 {dimension_numbers = #tpu.dot_dimension_numbers<[1], [0], [0], [1], [0, 0, 1, 1], [], []>} : vector<16x16xbf16>, vector<16x64xbf16>, vector<16x64xf32> -> vector<16x64xf32>
    %186 = arith.addf %183, %185 : vector<16x64xf32>
    %187 = vector.extract_strided_slice %186 {offsets = [0, 0], sizes = [16, 48], strides = [1, 1]} : vector<16x64xf32> to vector<16x48xf32>
    %188 = arith.negf %187 : vector<16x48xf32>
    %189 = math.exp %188 : vector<16x48xf32>
    %cst_55 = arith.constant 1.000000e+00 : f32
    %190 = vector.broadcast %cst_55 : f32 to vector<16x48xf32>
    %191 = arith.addf %190, %189 : vector<16x48xf32>
    %192 = arith.divf %190, %191 : vector<16x48xf32>
    %193 = vector.extract_strided_slice %192 {offsets = [0, 0], sizes = [16, 16], strides = [1, 1]} : vector<16x48xf32> to vector<16x16xf32>
    %194 = vector.extract_strided_slice %192 {offsets = [0, 16], sizes = [16, 16], strides = [1, 1]} : vector<16x48xf32> to vector<16x16xf32>
    %195 = vector.extract_strided_slice %192 {offsets = [0, 32], sizes = [16, 16], strides = [1, 1]} : vector<16x48xf32> to vector<16x16xf32>
    %196 = vector.extract_strided_slice %186 {offsets = [0, 48], sizes = [16, 16], strides = [1, 1]} : vector<16x64xf32> to vector<16x16xf32>
    %197 = math.tanh %196 : vector<16x16xf32>
    %198 = arith.mulf %194, %146 : vector<16x16xf32>
    %199 = arith.mulf %193, %197 : vector<16x16xf32>
    %200 = arith.addf %198, %199 : vector<16x16xf32>
    %201 = math.tanh %200 : vector<16x16xf32>
    %202 = arith.mulf %195, %201 : vector<16x16xf32>
    %203 = arith.index_cast %180 : i32 to index
    %c0_56 = arith.constant 0 : index
    %c0_57 = arith.constant 0 : index
    %204 = vector.load %arg4[%203, %c0_56, %c0_57] : memref<4x16x1xf32, #tpu.memory_space<vmem>>, vector<1x16x1xf32>
    %205 = vector.shape_cast %204 : vector<1x16x1xf32> to vector<16x1xf32>
    %cst_58 = arith.constant 5.000000e-01 : f32
    %206 = vector.broadcast %cst_58 : f32 to vector<16x1xf32>
    %207 = arith.cmpf ogt, %205, %206 : vector<16x1xf32>
    %208 = vector.shape_cast %207 : vector<16x1xi1> to vector<16x1xi1>
    %209 = vector.broadcast %208 : vector<16x1xi1> to vector<16x16xi1>
    %210 = arith.select %209, %202, %143 : vector<16x16xi1>, vector<16x16xf32>
    %211 = vector.shape_cast %207 : vector<16x1xi1> to vector<16x1xi1>
    %212 = vector.broadcast %211 : vector<16x1xi1> to vector<16x16xi1>
    %213 = arith.select %212, %200, %146 : vector<16x16xi1>, vector<16x16xf32>
    %c3_i32_59 = arith.constant 3 : i32
    %214 = arith.index_cast %c3_i32_59 : i32 to index
    %c0_60 = arith.constant 0 : index
    %c0_61 = arith.constant 0 : index
    %215 = vector.load %arg1[%214, %c0_60, %c0_61] : memref<4x16x64xf32, #tpu.memory_space<vmem>>, vector<1x16x64xf32>
    %216 = vector.shape_cast %215 : vector<1x16x64xf32> to vector<16x64xf32>
    %217 = arith.truncf %176 : vector<16x16xf32> to vector<16x16xbf16>
    %cst_62 = arith.constant dense<0.000000e+00> : vector<16x64xf32>
    %218 = tpu.matmul %217, %3, %cst_62 {dimension_numbers = #tpu.dot_dimension_numbers<[1], [0], [0], [1], [0, 0, 1, 1], [], []>} : vector<16x16xbf16>, vector<16x64xbf16>, vector<16x64xf32> -> vector<16x64xf32>
    %219 = arith.addf %216, %218 : vector<16x64xf32>
    %220 = vector.extract_strided_slice %219 {offsets = [0, 0], sizes = [16, 48], strides = [1, 1]} : vector<16x64xf32> to vector<16x48xf32>
    %221 = arith.negf %220 : vector<16x48xf32>
    %222 = math.exp %221 : vector<16x48xf32>
    %cst_63 = arith.constant 1.000000e+00 : f32
    %223 = vector.broadcast %cst_63 : f32 to vector<16x48xf32>
    %224 = arith.addf %223, %222 : vector<16x48xf32>
    %225 = arith.divf %223, %224 : vector<16x48xf32>
    %226 = vector.extract_strided_slice %225 {offsets = [0, 0], sizes = [16, 16], strides = [1, 1]} : vector<16x48xf32> to vector<16x16xf32>
    %227 = vector.extract_strided_slice %225 {offsets = [0, 16], sizes = [16, 16], strides = [1, 1]} : vector<16x48xf32> to vector<16x16xf32>
    %228 = vector.extract_strided_slice %225 {offsets = [0, 32], sizes = [16, 16], strides = [1, 1]} : vector<16x48xf32> to vector<16x16xf32>
    %229 = vector.extract_strided_slice %219 {offsets = [0, 48], sizes = [16, 16], strides = [1, 1]} : vector<16x64xf32> to vector<16x16xf32>
    %230 = math.tanh %229 : vector<16x16xf32>
    %231 = arith.mulf %227, %179 : vector<16x16xf32>
    %232 = arith.mulf %226, %230 : vector<16x16xf32>
    %233 = arith.addf %231, %232 : vector<16x16xf32>
    %234 = math.tanh %233 : vector<16x16xf32>
    %235 = arith.mulf %228, %234 : vector<16x16xf32>
    %236 = arith.index_cast %c3_i32_59 : i32 to index
    %c0_64 = arith.constant 0 : index
    %c0_65 = arith.constant 0 : index
    %237 = vector.load %arg3[%236, %c0_64, %c0_65] : memref<4x16x1xf32, #tpu.memory_space<vmem>>, vector<1x16x1xf32>
    %238 = vector.shape_cast %237 : vector<1x16x1xf32> to vector<16x1xf32>
    %cst_66 = arith.constant 5.000000e-01 : f32
    %239 = vector.broadcast %cst_66 : f32 to vector<16x1xf32>
    %240 = arith.cmpf ogt, %238, %239 : vector<16x1xf32>
    %241 = vector.shape_cast %240 : vector<16x1xi1> to vector<16x1xi1>
    %242 = vector.broadcast %241 : vector<16x1xi1> to vector<16x16xi1>
    %243 = arith.select %242, %235, %176 : vector<16x16xi1>, vector<16x16xf32>
    %244 = vector.shape_cast %240 : vector<16x1xi1> to vector<16x1xi1>
    %245 = vector.broadcast %244 : vector<16x1xi1> to vector<16x16xi1>
    %246 = arith.select %245, %233, %179 : vector<16x16xi1>, vector<16x16xf32>
    %c3_i32_67 = arith.constant 3 : i32
    %247 = arith.subi %c3_i32_67, %c3_i32_59 : i32
    %248 = arith.index_cast %247 : i32 to index
    %c0_68 = arith.constant 0 : index
    %c0_69 = arith.constant 0 : index
    %249 = vector.load %arg2[%248, %c0_68, %c0_69] : memref<4x16x64xf32, #tpu.memory_space<vmem>>, vector<1x16x64xf32>
    %250 = vector.shape_cast %249 : vector<1x16x64xf32> to vector<16x64xf32>
    %251 = arith.truncf %210 : vector<16x16xf32> to vector<16x16xbf16>
    %cst_70 = arith.constant dense<0.000000e+00> : vector<16x64xf32>
    %252 = tpu.matmul %251, %4, %cst_70 {dimension_numbers = #tpu.dot_dimension_numbers<[1], [0], [0], [1], [0, 0, 1, 1], [], []>} : vector<16x16xbf16>, vector<16x64xbf16>, vector<16x64xf32> -> vector<16x64xf32>
    %253 = arith.addf %250, %252 : vector<16x64xf32>
    %254 = vector.extract_strided_slice %253 {offsets = [0, 0], sizes = [16, 48], strides = [1, 1]} : vector<16x64xf32> to vector<16x48xf32>
    %255 = arith.negf %254 : vector<16x48xf32>
    %256 = math.exp %255 : vector<16x48xf32>
    %cst_71 = arith.constant 1.000000e+00 : f32
    %257 = vector.broadcast %cst_71 : f32 to vector<16x48xf32>
    %258 = arith.addf %257, %256 : vector<16x48xf32>
    %259 = arith.divf %257, %258 : vector<16x48xf32>
    %260 = vector.extract_strided_slice %259 {offsets = [0, 0], sizes = [16, 16], strides = [1, 1]} : vector<16x48xf32> to vector<16x16xf32>
    %261 = vector.extract_strided_slice %259 {offsets = [0, 16], sizes = [16, 16], strides = [1, 1]} : vector<16x48xf32> to vector<16x16xf32>
    %262 = vector.extract_strided_slice %259 {offsets = [0, 32], sizes = [16, 16], strides = [1, 1]} : vector<16x48xf32> to vector<16x16xf32>
    %263 = vector.extract_strided_slice %253 {offsets = [0, 48], sizes = [16, 16], strides = [1, 1]} : vector<16x64xf32> to vector<16x16xf32>
    %264 = math.tanh %263 : vector<16x16xf32>
    %265 = arith.mulf %261, %213 : vector<16x16xf32>
    %266 = arith.mulf %260, %264 : vector<16x16xf32>
    %267 = arith.addf %265, %266 : vector<16x16xf32>
    %268 = math.tanh %267 : vector<16x16xf32>
    %269 = arith.mulf %262, %268 : vector<16x16xf32>
    %270 = arith.index_cast %247 : i32 to index
    %c0_72 = arith.constant 0 : index
    %c0_73 = arith.constant 0 : index
    %271 = vector.load %arg4[%270, %c0_72, %c0_73] : memref<4x16x1xf32, #tpu.memory_space<vmem>>, vector<1x16x1xf32>
    %272 = vector.shape_cast %271 : vector<1x16x1xf32> to vector<16x1xf32>
    %cst_74 = arith.constant 5.000000e-01 : f32
    %273 = vector.broadcast %cst_74 : f32 to vector<16x1xf32>
    %274 = arith.cmpf ogt, %272, %273 : vector<16x1xf32>
    %275 = vector.shape_cast %274 : vector<16x1xi1> to vector<16x1xi1>
    %276 = vector.broadcast %275 : vector<16x1xi1> to vector<16x16xi1>
    %277 = arith.select %276, %269, %210 : vector<16x16xi1>, vector<16x16xf32>
    %278 = vector.shape_cast %274 : vector<16x1xi1> to vector<16x1xi1>
    %279 = vector.broadcast %278 : vector<16x1xi1> to vector<16x16xi1>
    %280 = arith.select %279, %267, %213 : vector<16x16xi1>, vector<16x16xf32>
    %c4_i32 = arith.constant 4 : i32
    %c0_75 = arith.constant 0 : index
    %c0_76 = arith.constant 0 : index
    %c0_77 = arith.constant 0 : index
    %281 = vector.load %arg8[%c0_75, %c0_76, %c0_77] : memref<2x16x16xf32, #tpu.memory_space<vmem>>, vector<1x16x16xf32>
    %282 = vector.shape_cast %281 : vector<1x16x16xf32> to vector<16x16xf32>
    %283 = vector.shape_cast %243 : vector<16x16xf32> to vector<1x16x16xf32>
    tpu.vector_store %arg8[%c0_75, %c0_76, %c0_77], %283 {strides = array<i32>} : memref<2x16x16xf32, #tpu.memory_space<vmem>>, vector<1x16x16xf32>,
    %c0_78 = arith.constant 0 : index
    %c0_79 = arith.constant 0 : index
    %c0_80 = arith.constant 0 : index
    %284 = vector.load %arg9[%c0_78, %c0_79, %c0_80] : memref<2x16x16xf32, #tpu.memory_space<vmem>>, vector<1x16x16xf32>
    %285 = vector.shape_cast %284 : vector<1x16x16xf32> to vector<16x16xf32>
    %286 = vector.shape_cast %246 : vector<16x16xf32> to vector<1x16x16xf32>
    tpu.vector_store %arg9[%c0_78, %c0_79, %c0_80], %286 {strides = array<i32>} : memref<2x16x16xf32, #tpu.memory_space<vmem>>, vector<1x16x16xf32>,
    %c1_81 = arith.constant 1 : index
    %c0_82 = arith.constant 0 : index
    %c0_83 = arith.constant 0 : index
    %287 = vector.load %arg8[%c1_81, %c0_82, %c0_83] : memref<2x16x16xf32, #tpu.memory_space<vmem>>, vector<1x16x16xf32>
    %288 = vector.shape_cast %287 : vector<1x16x16xf32> to vector<16x16xf32>
    %289 = vector.shape_cast %277 : vector<16x16xf32> to vector<1x16x16xf32>
    tpu.vector_store %arg8[%c1_81, %c0_82, %c0_83], %289 {strides = array<i32>} : memref<2x16x16xf32, #tpu.memory_space<vmem>>, vector<1x16x16xf32>,
    %c1_84 = arith.constant 1 : index
    %c0_85 = arith.constant 0 : index
    %c0_86 = arith.constant 0 : index
    %290 = vector.load %arg9[%c1_84, %c0_85, %c0_86] : memref<2x16x16xf32, #tpu.memory_space<vmem>>, vector<1x16x16xf32>
    %291 = vector.shape_cast %290 : vector<1x16x16xf32> to vector<16x16xf32>
    %292 = vector.shape_cast %280 : vector<16x16xf32> to vector<1x16x16xf32>
    tpu.vector_store %arg9[%c1_84, %c0_85, %c0_86], %292 {strides = array<i32>} : memref<2x16x16xf32, #tpu.memory_space<vmem>>, vector<1x16x16xf32>,
    %c0_87 = arith.constant 0 : index
    %c0_88 = arith.constant 0 : index
    %293 = vector.load %arg7[%c0_87, %c0_88] : memref<16x32xf32, #tpu.memory_space<vmem>>, vector<16x16xf32>
    tpu.vector_store %arg7[%c0_87, %c0_88], %243 {strides = array<i32>} : memref<16x32xf32, #tpu.memory_space<vmem>>, vector<16x16xf32>,
    %c0_89 = arith.constant 0 : index
    %c16 = arith.constant 16 : index
    %294 = vector.load %arg7[%c0_89, %c16] : memref<16x32xf32, #tpu.memory_space<vmem>>, vector<16x16xf32>
    tpu.vector_store %arg7[%c0_89, %c16], %277 {strides = array<i32>} : memref<16x32xf32, #tpu.memory_space<vmem>>, vector<16x16xf32>,
    return
  }
  func.func @transform_0(%arg0: i32) -> (i32, i32, i32) {
    %c0_i32 = arith.constant 0 : i32
    %c0_i32_0 = arith.constant 0 : i32
    %c0_i32_1 = arith.constant 0 : i32
    return %arg0, %c0_i32, %c0_i32_0 : i32, i32, i32
  }
  func.func @transform_1(%arg0: i32) -> (i32, i32, i32) {
    %c0_i32 = arith.constant 0 : i32
    %0 = arith.subi %c0_i32, %arg0 : i32
    %c0_i32_0 = arith.constant 0 : i32
    %c0_i32_1 = arith.constant 0 : i32
    %c0_i32_2 = arith.constant 0 : i32
    return %0, %c0_i32_0, %c0_i32_1 : i32, i32, i32
  }
  func.func @transform_2(%arg0: i32) -> (i32, i32, i32) {
    %c0_i32 = arith.constant 0 : i32
    %c0_i32_0 = arith.constant 0 : i32
    %c0_i32_1 = arith.constant 0 : i32
    return %arg0, %c0_i32, %c0_i32_0 : i32, i32, i32
  }
  func.func @transform_3(%arg0: i32) -> (i32, i32, i32) {
    %c0_i32 = arith.constant 0 : i32
    %0 = arith.subi %c0_i32, %arg0 : i32
    %c0_i32_0 = arith.constant 0 : i32
    %c0_i32_1 = arith.constant 0 : i32
    %c0_i32_2 = arith.constant 0 : i32
    return %0, %c0_i32_0, %c0_i32_1 : i32, i32, i32
  }
  func.func @transform_4(%arg0: i32) -> (i32, i32) {
    %c0_i32 = arith.constant 0 : i32
    %c0_i32_0 = arith.constant 0 : i32
    %c0_i32_1 = arith.constant 0 : i32
    return %c0_i32, %c0_i32_0 : i32, i32
  }
  func.func @transform_5(%arg0: i32) -> (i32, i32) {
    %c0_i32 = arith.constant 0 : i32
    %c0_i32_0 = arith.constant 0 : i32
    %c0_i32_1 = arith.constant 0 : i32
    return %c0_i32, %c0_i32_0 : i32, i32
  }
  func.func @transform_6(%arg0: i32) -> (i32, i32) {
    %c0_i32 = arith.constant 0 : i32
    %c0_i32_0 = arith.constant 0 : i32
    %c0_i32_1 = arith.constant 0 : i32
    return %c0_i32, %c0_i32_0 : i32, i32
  }
}

</mosaic_0001>

<bundles_post_ra>
// kernel: tpu_custom_call.1
= control target key start
LH: loop header
LB: loop body
LE: loop exit
PB: predicated region body
PF: predicated region fallthrough
CT: control target
= control target key end

     0   :  { %v1455_v1 = vmov 0.0   ;;  %vm1456_vm0 = vmmov 0   ;;  %vm79_vm1 = vcmask 130048   ;;  %s2082_s0 = inlined_call_operand.vmem [shape: f32[4,16,64], index: 0, kind: input, shape index: {}]   ;;  %s2083_s1 = inlined_call_operand.vmem [shape: f32[4,16,64], index: 1, kind: input, shape index: {}]   ;;  %s2084_s2 = inlined_call_operand.vmem [shape: f32[4,16,1], index: 2, kind: input, shape index: {}]   ;;  %s2085_s3 = inlined_call_operand.vmem [shape: f32[4,16,1], index: 3, kind: input, shape index: {}]   ;;  %s2086_s4 = inlined_call_operand.vmem [shape: bf16[16,64], index: 4, kind: input, shape index: {}]   ;;  %s2087_s5 = inlined_call_operand.vmem [shape: bf16[16,64], index: 5, kind: input, shape index: {}]   ;;  %s2088_s6 = inlined_call_operand.hbm [shape: f32[16,32], index: 6, kind: output, shape index: {}]  }
   0x1   :  { %v1504_v0 = vld [vmem:[%s2086_s4] sm:$0xff]   ;;  %1242 = vmatprep.subr.bf16.mxu0 %v1455_v1  ;;  %1248 = vmatprep.subr.bf16.mxu1 %v1455_v1 }
   0x2   :  { %v1511_v2 = vld [vmem:[%s2087_s5] sm:$0xff]   ;;  %1243 = vmatpush3.bf16.msra.mxu0 %v1504_v0  ;;  %1244 = vmatprep.mubr.msk.bf16.mxu0 %vm1456_vm0, %v1455_v1 }
   0x3   :  { %11 = vsyncpa [#allocation5], 0  ;;  %1249 = vmatpush3.bf16.msra.mxu1 %v1511_v2  ;;  %1250 = vmatprep.mubr.msk.bf16.mxu1 %vm1456_vm0, %v1455_v1  ;;  %80 = vst.msk [vmem:[#allocation2] sm:$0xff] %vm79_vm1, %v1455_v1  ;;  %v102_v9 = vld [vmem:[%s2082_s0] sm:$0xff]  ;;  %v1180_v10 = vld [vmem:[%s2083_s1 + $0x30] sm:$0xff]  ;;  %v1457_v25 = vmov 0  }
   0x4   :  { %81 = vst.msk [vmem:[#allocation2 + $0x8] sm:$0xff] %vm79_vm1, %v1455_v1  ;;  %82 = vst.msk [vmem:[#allocation2 + $0x10] sm:$0xff] %vm79_vm1, %v1455_v1  ;;  %1254 = vmatprep.subr.bf16.mxu0 %v1455_v1  ;;  %1260 = vmatprep.subr.bf16.mxu1 %v1455_v1  ;;  %v103_v16 = vld [vmem:[%s2082_s0 + $0x8] sm:$0xff]  ;;  %v1181_v18 = vld [vmem:[%s2083_s1 + $0x38] sm:$0xff]  ;;  %s1458_s7 = smov 80   ;;  %s1459_s8 = smov 16  }
   0x5   :  { %83 = vst.msk [vmem:[#allocation2 + $0x18] sm:$0xff] %vm79_vm1, %v1455_v1  ;;  %84 = vst.msk [vmem:[#allocation3] sm:$0xff] %vm79_vm1, %v1455_v1  ;;  %1301 = vset.pattern.permute.xlu0 %v1457_v25  ;;  %1302 = vset.pattern.permute.xlu1 %v1457_v25  ;;  %v214_v50 = vld [vmem:[%s2084_s2] sm:$0xff]  ;;  %v1187_v57 = vld [vmem:[%s2085_s3 + $0x38] sm:$0xff]  ;;  %s1460_s17 = smov 32   ;;  %s1461_s18 = smov 96  }
   0x6   :  { %85 = vst.msk [vmem:[#allocation3 + $0x8] sm:$0xff] %vm79_vm1, %v1455_v1  ;;  %86 = vst.msk [vmem:[#allocation3 + $0x10] sm:$0xff] %vm79_vm1, %v1455_v1  ;;  %vm216_vm2 = vcmp.gt.f32.partialorder %v214_v50, 0.5  ;;  %v215_v58 = vld [vmem:[%s2084_s2 + $0x8] sm:$0xff]  ;;  %vm356_vm3 = vcmp.gt.f32.partialorder %v1187_v57, 0.5  ;;  %v1186_v62 = vld [vmem:[%s2085_s3 + $0x30] sm:$0xff] }
   0x7   :  { %87 = vst.msk [vmem:[#allocation3 + $0x18] sm:$0xff] %vm79_vm1, %v1455_v1  ;;  %v218_v60 = vsel %vm216_vm2, 1, %v1457_v25  ;;  %vm217_vm4 = vcmp.gt.f32.partialorder %v215_v58, 0.5  ;;  %v358_v63 = vsel %vm356_vm3, 1, %v1457_v25  ;;  %vm355_vm5 = vcmp.gt.f32.partialorder %v1186_v62, 0.5  ;;  %v1188_v50 = vld [vmem:[%s2082_s0 + $0x10] sm:$0xff] }
   0x8   :  { %v1196_v62 = vld [vmem:[%s2083_s1 + $0x28] sm:$0xff] }
   0xa   :  { %v1537_v3 = vld [vmem:[#allocation2] sm:$0xff] }
   0xb   :  { %v1539_v4 = vld [vmem:[#allocation2 + $0x8] sm:$0xff]  ;;  %v1541_v5 = vld [vmem:[#allocation2 + $0x10] sm:$0xff] }
   0xc   :  { %v104_v6 = vpack.c.bf16 %v1539_v4, %v1537_v3  ;;  %v1545_v7 = vld [vmem:[#allocation2 + $0x18] sm:$0xff]  ;;  %v94_v30 = vld [vmem:[#allocation3] sm:$0xff] }
   0xd   :  { %v243_v8 = vpack.c.bf16 %v1545_v7, %v1541_v5  ;;  %v95_v31 = vld [vmem:[#allocation3 + $0x8] sm:$0xff]  ;;  %v100_v32 = vld [vmem:[#allocation3 + $0x10] sm:$0xff] }
   0xe   :  { %1245 = vmatmul.mubr.msk.bf16.vlgmr.msra.gmra.mxu0 %vm79_vm1, %v104_v6  ;;  %v101_v33 = vld [vmem:[#allocation3 + $0x18] sm:$0xff]  ;;  %v219_v6 = vsel %vm217_vm4, 1, %v1457_v25 }
   0xf   :  { %1251 = vmatmul.mubr.msk.bf16.vlgmr.msra.gmra.mxu1 %vm79_vm1, %v243_v8  ;;  %1255 = vmatpush3.bf16.msra.mxu0 %v1504_v0  ;;  %v357_v8 = vsel %vm355_vm5, 1, %v1457_v25 }
  0x10   :  { %1261 = vmatpush3.bf16.msra.mxu1 %v1511_v2  ;;  %1256 = vmatprep.mubr.msk.bf16.mxu0 %vm1456_vm0, %v1455_v1 }
  0x11   :  { %1262 = vmatprep.mubr.msk.bf16.mxu1 %vm1456_vm0, %v1455_v1  ;;  %1266 = vmatprep.subr.bf16.mxu0 %v1455_v1 }
  0x12   :  { %1272 = vmatprep.subr.bf16.mxu1 %v1455_v1 }
  0xce   :  { %v149_v11 = vpop.f32.mrf.mxu0 }
  0xcf   :  { %v156_v12 = vadd.f32 %v149_v11, %v102_v9  ;;  %v287_v13 = vpop.f32.mrf.mxu1 }
  0xd0   :  { %v294_v14 = vadd.f32 %v1180_v10, %v287_v13  ;;  %v1246_v15 = vpop.f32.mrf.mxu0 }
  0xd1   :  { %1305 = vtanh.f32 %v156_v12  ;;  %v1252_v17 = vpop.f32.mrf.mxu1  ;;  %v1178_v34 = vmul.f32 -1.442695, %v156_v12 }
  0xd2   :  { %1307 = vtanh.f32 %v294_v14  ;;  %v152_v19 = vpop.f32.mrf.mxu0  ;;  %v1184_v35 = vmul.f32 -1.442695, %v294_v14 }
  0xd3   :  { %v157_v20 = vadd.f32 %v152_v19, %v103_v16  ;;  %v290_v21 = vpop.f32.mrf.mxu1 }
  0xd4   :  { %v295_v22 = vadd.f32 %v1181_v18, %v290_v21  ;;  %v1247_v23 = vpop.f32.mrf.mxu0 }
  0xd5   :  { %1309 = vtanh.f32 %v157_v20  ;;  %v1253_v24 = vpop.f32.mrf.mxu1  ;;  %v1179_v36 = vmul.f32 -1.442695, %v157_v20 }
  0xd6   :  { %1311 = vtanh.f32 %v295_v22  ;;  %v1185_v37 = vmul.f32 -1.442695, %v295_v22 }
  0xd7   :  { %1313 = vpow2.f32 %v1178_v34 }
  0xd8   :  { %1315 = vpow2.f32 %v1184_v35 }
  0xd9   :  { %1317 = vpow2.f32 %v1179_v36 }
  0xda   :  { %1319 = vpow2.f32 %v1185_v37 }
  0xde   :  { %v1306_v26 = vpop.eup %1305 }
  0xdf   :  { %v1308_v27 = vpop.eup %1307  ;;  %184 = vrot.lane.b32.xlu0 %v1306_v26, %s1458_s7 }
  0xe0   :  { %322 = vrot.lane.b32.xlu1 %v1308_v27, %s1458_s7 }
  0xe2   :  { %v1310_v28 = vpop.eup %1309 }
  0xe3   :  { %v1312_v29 = vpop.eup %1311  ;;  %186 = vrot.lane.b32.xlu0 %v1310_v28, %s1458_s7 }
  0xe4   :  { %324 = vrot.lane.b32.xlu1 %v1312_v29, %s1458_s7  ;;  %v1314_v38 = vpop.eup %1313 }
  0xe5   :  { %v1316_v39 = vpop.eup %1315  ;;  %v164_v40 = vadd.f32 1.0, %v1314_v38 }
  0xe6   :  { %v1318_v41 = vpop.eup %1317  ;;  %v302_v42 = vadd.f32 1.0, %v1316_v39 }
  0xe7   :  { %174 = vrot.lane.b32.xlu0 %v94_v30, %s1459_s8  ;;  %1321 = vrcp.f32 %v164_v40  ;;  %v165_v43 = vadd.f32 1.0, %v1318_v41  ;;  %v1320_v44 = vpop.eup %1319 }
  0xe8   :  { %176 = vrot.lane.b32.xlu1 %v95_v31, %s1459_s8  ;;  %1323 = vrcp.f32 %v302_v42  ;;  %v303_v45 = vadd.f32 1.0, %v1320_v44 }
  0xe9   :  { %1325 = vrcp.f32 %v165_v43 }
  0xea   :  { %1327 = vrcp.f32 %v303_v45 }
  0xeb   :  { %312 = vrot.lane.b32.xlu0 %v100_v32, %s1459_s8 }
  0xec   :  { %314 = vrot.lane.b32.xlu1 %v101_v33, %s1459_s8 }
  0xf4   :  { %v1581_v46 = vpop.eup %1321 }
  0xf5   :  { %v1587_v51 = vpop.eup %1323 }
  0xf6   :  { %v1590_v52 = vpop.eup %1325 }
  0xf7   :  { %v1602_v59 = vpop.eup %1327 }
 0x151   :  { %v185_v47 = vpop.permute.xlu0 %184 }
 0x152   :  { %v323_v48 = vpop.permute.xlu1 %322  ;;  %v190_v49 = vmul.f32 %v1581_v46, %v185_v47 }
 0x153   :  { %v328_v54 = vmul.f32 %v1587_v51, %v323_v48 }
 0x154   :  { %194 = vrot.lane.b32.xlu0 %v190_v49, %s1459_s8 }
 0x155   :  { %v187_v53 = vpop.permute.xlu0 %186 }
 0x156   :  { %v191_v55 = vmul.f32 %v1590_v52, %v187_v53  ;;  %v325_v56 = vpop.permute.xlu1 %324 }
 0x157   :  { %v329_v61 = vmul.f32 %v1602_v59, %v325_v56  ;;  %v1195_v56 = vld [vmem:[%s2083_s1 + $0x20] sm:$0xff] }
 0x158   :  { %332 = vrot.lane.b32.xlu0 %v328_v54, %s1459_s8  ;;  %196 = vrot.lane.b32.xlu1 %v191_v55, %s1459_s8  ;;  %v1189_v54 = vld [vmem:[%s2082_s0 + $0x18] sm:$0xff] }
 0x159   :  { %v1617_v9 = vpop.permute.xlu0 %174 }
 0x15a   :  { %v1619_v10 = vpop.permute.xlu1 %176  ;;  %v180_v12 = vmul.f32 %v1581_v46, %v1617_v9 }
 0x15c   :  { %221 = vperm.xlu0 %1301, %v218_v60   ;;  %334 = vrot.lane.b32.xlu1 %v329_v61, %s1459_s8 }
 0x15d   :  { %v1621_v11 = vpop.permute.xlu0 %312 }
 0x15e   :  { %v1625_v13 = vpop.permute.xlu1 %314 }
 0x15f   :  { %v319_v20 = vmul.f32 %v1602_v59, %v1625_v13 }
 0x160   :  { %363 = vperm.xlu0 %1301, %v358_v63   ;;  %224 = vperm.xlu1 %1302, %v219_v6  }
 0x164   :  { %360 = vperm.xlu1 %1302, %v357_v8   ;;  %232 = vrot.lane.b32.xlu0 %v1539_v4, %s1460_s17  ;;  %v181_v4 = vmul.f32 %v1590_v52, %v1619_v10 }
 0x168   :  { %230 = vrot.lane.b32.xlu1 %v1537_v3, %s1460_s17  ;;  %v318_v3 = vmul.f32 %v1587_v51, %v1621_v11 }
 0x1c6   :  { %v195_v14 = vpop.permute.xlu0 %194 }
 0x1c7   :  { %v1627_v15 = vadd.f32 %v195_v14, %v180_v12 }
 0x1c9   :  { %1329 = vtanh.f32 %v1627_v15 }
 0x1ca   :  { %v333_v16 = vpop.permute.xlu0 %332  ;;  %v197_v17 = vpop.permute.xlu1 %196 }
 0x1cb   :  { %v1634_v18 = vadd.f32 %v333_v16, %v318_v3  ;;  %v1636_v19 = vadd.f32 %v197_v17, %v181_v4 }
 0x1cd   :  { %1331 = vtanh.f32 %v1634_v18 }
 0x1ce   :  { %1333 = vtanh.f32 %v1636_v19  ;;  %v335_v21 = vpop.permute.xlu1 %334 }
 0x1cf   :  { %v1642_v22 = vadd.f32 %v335_v21, %v319_v20 }
 0x1d1   :  { %1335 = vtanh.f32 %v1642_v22 }
 0x1d6   :  { %v1330_v23 = vpop.eup %1329 }
 0x1d7   :  { %206 = vrot.lane.b32.xlu1 %v1330_v23, %s1459_s8  ;;  %v1655_v29 = vpop.permute.xlu0 %221 }
 0x1d8   :  { %vm226_vm6 = vcmp.eq.s32.totalorder %v1655_v29, 1 }
 0x1da   :  { %v1332_v24 = vpop.eup %1331 }
 0x1db   :  { %v1334_v26 = vpop.eup %1333  ;;  %344 = vrot.lane.b32.xlu1 %v1332_v24, %s1459_s8  ;;  %v1653_v28 = vpop.permute.xlu1 %224 }
 0x1dc   :  { %208 = vrot.lane.b32.xlu0 %v1334_v26, %s1459_s8  ;;  %v1659_v32 = vpop.permute.xlu0 %363  ;;  %vm227_vm7 = vcmp.eq.s32.totalorder %v1653_v28, 1 }
 0x1dd   :  { %vm366_vm8 = vcmp.eq.s32.totalorder %v1659_v32, 1 }
 0x1de   :  { %v1336_v27 = vpop.eup %1335 }
 0x1df   :  { %369 = vrot.lane.b32.xlu1 %v1541_v5, %s1460_s17  ;;  %v1657_v30 = vpop.permute.xlu1 %360 }
 0x1e0   :  { %346 = vrot.lane.b32.xlu0 %v1336_v27, %s1459_s8  ;;  %v233_v33 = vpop.permute.xlu0 %232  ;;  %vm365_vm9 = vcmp.eq.s32.totalorder %v1657_v30, 1 }
 0x1e3   :  { %v231_v31 = vpop.permute.xlu1 %230 }
 0x1e4   :  { %371 = vrot.lane.b32.xlu0 %v1545_v7, %s1460_s17 }
 0x249   :  { %v207_v34 = vpop.permute.xlu1 %206 }
 0x24a   :  { %v212_v35 = vmul.f32 %v1581_v46, %v207_v34 }
 0x24c   :  { %v1667_v7 = vsel %vm226_vm6, %v212_v35, %v231_v31 }
 0x24d   :  { %v345_v36 = vpop.permute.xlu1 %344 }
 0x24e   :  { %v209_v5 = vpop.permute.xlu0 %208  ;;  %v350_v42 = vmul.f32 %v1587_v51, %v345_v36 }
 0x24f   :  { %v213_v37 = vmul.f32 %v1590_v52, %v209_v5 }
 0x251   :  { %v1671_v38 = vsel %vm227_vm7, %v213_v37, %v233_v33  ;;  %v370_v41 = vpop.permute.xlu1 %369 }
 0x252   :  { %v347_v39 = vpop.permute.xlu0 %346  ;;  %v382_v40 = vpack.c.bf16 %v1671_v38, %v1667_v7  ;;  %v1682_v45 = vsel %vm365_vm9, %v350_v42, %v370_v41  ;;  %v1193_v42 = vld [vmem:[%s2084_s2 + $0x10] sm:$0xff] }
 0x253   :  { %v351_v43 = vmul.f32 %v1602_v59, %v347_v39  ;;  %vm483_vm10 = vcmp.gt.f32.partialorder %v1193_v42, 0.5 }
 0x254   :  { %384 = vrot.lane.b32.xlu1 %v382_v40, %s1461_s18 }
 0x256   :  { %v372_v44 = vpop.permute.xlu0 %371 }
 0x257   :  { %v1686_v46 = vsel %vm366_vm8, %v351_v43, %v372_v44 }
 0x258   :  { %v502_v47 = vpack.c.bf16 %v1686_v46, %v1682_v45 }
 0x25a   :  { %504 = vrot.lane.b32.xlu0 %v502_v47, %s1461_s18 }
 0x2c6   :  { %v385_v48 = vpop.permute.xlu1 %384 }
 0x2c7   :  { %1257 = vmatmul.mubr.msk.bf16.vlgmr.msra.gmra.mxu0 %vm79_vm1, %v385_v48  ;;  %v1194_v48 = vld [vmem:[%s2084_s2 + $0x18] sm:$0xff] }
 0x2c8   :  { %1267 = vmatpush3.bf16.msra.mxu0 %v1504_v0  ;;  %1268 = vmatprep.mubr.msk.bf16.mxu0 %vm1456_vm0, %v1455_v1  ;;  %vm484_vm11 = vcmp.gt.f32.partialorder %v1194_v48, 0.5 }
 0x2c9   :  { %1278 = vmatprep.subr.bf16.mxu0 %v1455_v1 }
 0x2cc   :  { %v505_v49 = vpop.permute.xlu0 %504 }
 0x2cd   :  { %1263 = vmatmul.mubr.msk.bf16.vlgmr.msra.gmra.mxu1 %vm79_vm1, %v505_v49  ;;  %v1200_v49 = vld [vmem:[%s2085_s3 + $0x20] sm:$0xff] }
 0x2ce   :  { %1273 = vmatpush3.bf16.msra.mxu1 %v1511_v2  ;;  %1274 = vmatprep.mubr.msk.bf16.mxu1 %vm1456_vm0, %v1455_v1  ;;  %vm603_vm12 = vcmp.gt.f32.partialorder %v1200_v49, 0.5 }
 0x2cf   :  { %1284 = vmatprep.subr.bf16.mxu1 %v1455_v1 }
 0x387   :  { %v423_v51 = vpop.f32.mrf.mxu0 }
 0x388   :  { %v430_v52 = vadd.f32 %v1188_v50, %v423_v51 }
 0x389   :  { %v1258_v53 = vpop.f32.mrf.mxu0 }
 0x38a   :  { %1337 = vtanh.f32 %v430_v52  ;;  %v1191_v16 = vmul.f32 -1.442695, %v430_v52  ;;  %v485_v53 = vsel %vm483_vm10, 1, %v1457_v25 }
 0x38b   :  { %v426_v55 = vpop.f32.mrf.mxu0 }
 0x38c   :  { %v431_v57 = vadd.f32 %v1189_v54, %v426_v55  ;;  %v1201_v54 = vld [vmem:[%s2085_s3 + $0x28] sm:$0xff]  ;;  %v486_v55 = vsel %vm484_vm11, 1, %v1457_v25 }
 0x38d   :  { %v1259_v58 = vpop.f32.mrf.mxu0  ;;  %v543_v59 = vpop.f32.mrf.mxu1  ;;  %vm604_vm13 = vcmp.gt.f32.partialorder %v1201_v54, 0.5 }
 0x38e   :  { %1339 = vtanh.f32 %v431_v57  ;;  %v550_v60 = vadd.f32 %v1195_v56, %v543_v59  ;;  %v1192_v17 = vmul.f32 -1.442695, %v431_v57  ;;  %v605_v56 = vsel %vm603_vm12, 1, %v1457_v25 }
 0x38f   :  { %v1264_v61 = vpop.f32.mrf.mxu1  ;;  %v606_v57 = vsel %vm604_vm13, 1, %v1457_v25  ;;  %v1750_v58 = vsel %vm226_vm6, %v1627_v15, %v1617_v9  ;;  %v1769_v9 = vsel %vm365_vm9, %v1634_v18, %v1621_v11 }
 0x390   :  { %1341 = vtanh.f32 %v550_v60  ;;  %v1198_v20 = vmul.f32 -1.442695, %v550_v60 }
 0x391   :  { %v546_v63 = vpop.f32.mrf.mxu1 }
 0x392   :  { %v551_v6 = vadd.f32 %v1196_v62, %v546_v63  ;;  %v1760_v62 = vsel %vm227_vm7, %v1636_v19, %v1619_v10  ;;  %v1780_v19 = vsel %vm366_vm8, %v1642_v22, %v1625_v13 }
 0x393   :  { %v1265_v8 = vpop.f32.mrf.mxu1 }
 0x394   :  { %1343 = vtanh.f32 %v551_v6  ;;  %v1199_v21 = vmul.f32 -1.442695, %v551_v6 }
 0x395   :  { %1345 = vpow2.f32 %v1191_v16 }
 0x396   :  { %1347 = vpow2.f32 %v1192_v17 }
 0x397   :  { %v1338_v12 = vpop.eup %1337  ;;  %1349 = vpow2.f32 %v1198_v20 }
 0x398   :  { %450 = vrot.lane.b32.xlu1 %v1338_v12, %s1458_s7  ;;  %1351 = vpow2.f32 %v1199_v21 }
 0x39b   :  { %v1340_v14 = vpop.eup %1339 }
 0x39c   :  { %452 = vrot.lane.b32.xlu0 %v1340_v14, %s1458_s7 }
 0x39d   :  { %v1342_v4 = vpop.eup %1341 }
 0x39e   :  { %570 = vrot.lane.b32.xlu1 %v1342_v4, %s1458_s7 }
 0x3a1   :  { %v1344_v3 = vpop.eup %1343 }
 0x3a2   :  { %572 = vrot.lane.b32.xlu0 %v1344_v3, %s1458_s7  ;;  %v1346_v23 = vpop.eup %1345 }
 0x3a3   :  { %v438_v24 = vadd.f32 1.0, %v1346_v23  ;;  %v1348_v26 = vpop.eup %1347 }
 0x3a4   :  { %v1350_v27 = vpop.eup %1349  ;;  %v439_v31 = vadd.f32 1.0, %v1348_v26 }
 0x3a5   :  { %1353 = vrcp.f32 %v438_v24  ;;  %v1352_v33 = vpop.eup %1351  ;;  %v558_v34 = vadd.f32 1.0, %v1350_v27 }
 0x3a6   :  { %1355 = vrcp.f32 %v439_v31  ;;  %v559_v35 = vadd.f32 1.0, %v1352_v33 }
 0x3a7   :  { %1357 = vrcp.f32 %v558_v34 }
 0x3a8   :  { %1359 = vrcp.f32 %v559_v35 }
 0x3b2   :  { %v1717_v36 = vpop.eup %1353 }
 0x3b3   :  { %v1721_v39 = vpop.eup %1355  ;;  %v446_v59 = vmul.f32 %v1717_v36, %v1750_v58 }
 0x3b4   :  { %v1727_v43 = vpop.eup %1357  ;;  %v447_v63 = vmul.f32 %v1721_v39, %v1760_v62 }
 0x3b5   :  { %v1360_v50 = vpop.eup %1359  ;;  %v566_v6 = vmul.f32 %v1727_v43, %v1769_v9 }
 0x3b6   :  { %v567_v30 = vmul.f32 %v1360_v50, %v1780_v19 }
 0x40a   :  { %v451_v5 = vpop.permute.xlu1 %450 }
 0x40b   :  { %v456_v37 = vmul.f32 %v1717_v36, %v451_v5 }
 0x40d   :  { %460 = vrot.lane.b32.xlu1 %v456_v37, %s1459_s8 }
 0x40e   :  { %v453_v40 = vpop.permute.xlu0 %452 }
 0x40f   :  { %v457_v41 = vmul.f32 %v1721_v39, %v453_v40 }
 0x410   :  { %v571_v44 = vpop.permute.xlu1 %570 }
 0x411   :  { %462 = vrot.lane.b32.xlu0 %v457_v41, %s1459_s8  ;;  %v576_v47 = vmul.f32 %v1727_v43, %v571_v44 }
 0x413   :  { %580 = vrot.lane.b32.xlu1 %v576_v47, %s1459_s8  ;;  %v1210_v47 = vld [vmem:[%s2083_s1 + $0x18] sm:$0xff] }
 0x414   :  { %v573_v51 = vpop.permute.xlu0 %572 }
 0x415   :  { %v577_v52 = vmul.f32 %v1360_v50, %v573_v51 }
 0x417   :  { %582 = vrot.lane.b32.xlu0 %v577_v52, %s1459_s8  ;;  %488 = vperm.xlu1 %1302, %v485_v53  }
 0x41b   :  { %491 = vperm.xlu0 %1301, %v486_v55   ;;  %608 = vperm.xlu1 %1302, %v605_v56  }
 0x41f   :  { %611 = vperm.xlu0 %1301, %v606_v57  }
 0x47f   :  { %v461_v60 = vpop.permute.xlu1 %460 }
 0x480   :  { %v1754_v61 = vadd.f32 %v461_v60, %v446_v59 }
 0x482   :  { %1361 = vtanh.f32 %v1754_v61 }
 0x483   :  { %v463_v29 = vpop.permute.xlu0 %462 }
 0x484   :  { %v1771_v15 = vadd.f32 %v463_v29, %v447_v63 }
 0x485   :  { %v581_v10 = vpop.permute.xlu1 %580 }
 0x486   :  { %1363 = vtanh.f32 %v1771_v15  ;;  %v1782_v28 = vadd.f32 %v581_v10, %v566_v6 }
 0x488   :  { %1365 = vtanh.f32 %v1782_v28 }
 0x489   :  { %v583_v11 = vpop.permute.xlu0 %582 }
 0x48a   :  { %v1786_v18 = vadd.f32 %v583_v11, %v567_v30 }
 0x48c   :  { %1367 = vtanh.f32 %v1786_v18 }
 0x48f   :  { %v1362_v8 = vpop.eup %1361 }
 0x490   :  { %472 = vrot.lane.b32.xlu1 %v1362_v8, %s1459_s8 }
 0x492   :  { %v1793_v22 = vpop.permute.xlu1 %488 }
 0x493   :  { %v1364_v12 = vpop.eup %1363  ;;  %vm493_vm14 = vcmp.eq.s32.totalorder %v1793_v22, 1 }
 0x494   :  { %474 = vrot.lane.b32.xlu0 %v1364_v12, %s1459_s8 }
 0x495   :  { %v1366_v32 = vpop.eup %1365 }
 0x496   :  { %592 = vrot.lane.b32.xlu1 %v1366_v32, %s1459_s8  ;;  %v1795_v14 = vpop.permute.xlu0 %491  ;;  %v1797_v4 = vpop.permute.xlu1 %608 }
 0x497   :  { %vm494_vm15 = vcmp.eq.s32.totalorder %v1795_v14, 1  ;;  %vm613_vm2 = vcmp.eq.s32.totalorder %v1797_v4, 1 }
 0x499   :  { %v1368_v13 = vpop.eup %1367 }
 0x49a   :  { %594 = vrot.lane.b32.xlu0 %v1368_v13, %s1459_s8  ;;  %v1799_v3 = vpop.permute.xlu0 %611 }
 0x49b   :  { %vm614_vm3 = vcmp.eq.s32.totalorder %v1799_v3, 1 }
 0x502   :  { %v473_v16 = vpop.permute.xlu1 %472 }
 0x503   :  { %v478_v17 = vmul.f32 %v1717_v36, %v473_v16 }
 0x505   :  { %v1808_v24 = vsel %vm493_vm14, %v478_v17, %v1667_v7 }
 0x506   :  { %v475_v20 = vpop.permute.xlu0 %474 }
 0x507   :  { %v479_v21 = vmul.f32 %v1721_v39, %v475_v20 }
 0x508   :  { %v593_v23 = vpop.permute.xlu1 %592 }
 0x509   :  { %v1813_v26 = vsel %vm494_vm15, %v479_v21, %v1671_v38  ;;  %v598_v31 = vmul.f32 %v1727_v43, %v593_v23  ;;  %v1207_v21 = vld [vmem:[%s2084_s2 + $0x20] sm:$0xff] }
 0x50a   :  { %v622_v27 = vpack.c.bf16 %v1813_v26, %v1808_v24 }
 0x50b   :  { %v1824_v7 = vsel %vm613_vm2, %v598_v31, %v1682_v45 }
 0x50c   :  { %624 = vrot.lane.b32.xlu1 %v622_v27, %s1461_s18  ;;  %v595_v33 = vpop.permute.xlu0 %594 }
 0x50d   :  { %v599_v34 = vmul.f32 %v1360_v50, %v595_v33  ;;  %v1208_v33 = vld [vmem:[%s2084_s2 + $0x28] sm:$0xff] }
 0x50e   :  { %vm724_vm4 = vcmp.gt.f32.partialorder %v1208_v33, 0.5 }
 0x50f   :  { %v1829_v38 = vsel %vm614_vm3, %v599_v34, %v1686_v46  ;;  %v1202_v46 = vld [vmem:[%s2082_s0 + $0x20] sm:$0xff]  ;;  %v1214_v34 = vld [vmem:[%s2085_s3 + $0x10] sm:$0xff] }
 0x510   :  { %v742_v35 = vpack.c.bf16 %v1829_v38, %v1824_v7  ;;  %vm843_vm5 = vcmp.gt.f32.partialorder %v1214_v34, 0.5 }
 0x512   :  { %744 = vrot.lane.b32.xlu0 %v742_v35, %s1461_s18 }
 0x57e   :  { %v625_v36 = vpop.permute.xlu1 %624 }
 0x57f   :  { %1269 = vmatmul.mubr.msk.bf16.vlgmr.msra.gmra.mxu0 %vm79_vm1, %v625_v36 }
 0x580   :  { %1279 = vmatpush3.bf16.msra.mxu0 %v1504_v0  ;;  %1280 = vmatprep.mubr.msk.bf16.mxu0 %vm1456_vm0, %v1455_v1  ;;  %v1203_v0 = vld [vmem:[%s2082_s0 + $0x28] sm:$0xff] }
 0x584   :  { %v745_v45 = vpop.permute.xlu0 %744 }
 0x585   :  { %1275 = vmatmul.mubr.msk.bf16.vlgmr.msra.gmra.mxu1 %vm79_vm1, %v745_v45 }
 0x586   :  { %1285 = vmatpush3.bf16.msra.mxu1 %v1511_v2  ;;  %1286 = vmatprep.mubr.msk.bf16.mxu1 %vm1456_vm0, %v1455_v1  ;;  %v1209_v2 = vld [vmem:[%s2083_s1 + $0x10] sm:$0xff]  ;;  %vm723_vm0 = vcmp.gt.f32.partialorder %v1207_v21, 0.5 }
 0x63f   :  { %v663_v5 = vpop.f32.mrf.mxu0 }
 0x640   :  { %v670_v37 = vadd.f32 %v1202_v46, %v663_v5  ;;  %v725_v46 = vsel %vm723_vm0, 1, %v1457_v25  ;;  %v1215_v5 = vld [vmem:[%s2085_s3 + $0x18] sm:$0xff] }
 0x641   :  { %v1270_v39 = vpop.f32.mrf.mxu0  ;;  %vm844_vm6 = vcmp.gt.f32.partialorder %v1215_v5, 0.5 }
 0x642   :  { %1369 = vtanh.f32 %v670_v37  ;;  %v1205_v55 = vmul.f32 -1.442695, %v670_v37  ;;  %v726_v37 = vsel %vm724_vm4, 1, %v1457_v25  ;;  %v845_v39 = vsel %vm843_vm5, 1, %v1457_v25 }
 0x643   :  { %v666_v40 = vpop.f32.mrf.mxu0  ;;  %vm1145_vm4 = vcmask 261248  }
 0x644   :  { %v671_v41 = vadd.f32 %v1203_v0, %v666_v40  ;;  %v846_v0 = vsel %vm844_vm6, 1, %v1457_v25  ;;  %v1891_v40 = vsel %vm493_vm14, %v1754_v61, %v1750_v58  ;;  %v1910_v58 = vsel %vm613_vm2, %v1782_v28, %v1769_v9 }
 0x645   :  { %v1271_v42 = vpop.f32.mrf.mxu0  ;;  %v783_v1 = vpop.f32.mrf.mxu1 }
 0x646   :  { %1371 = vtanh.f32 %v671_v41  ;;  %v790_v43 = vadd.f32 %v1209_v2, %v783_v1  ;;  %v1206_v56 = vmul.f32 -1.442695, %v671_v41  ;;  %v1901_v1 = vsel %vm494_vm15, %v1771_v15, %v1760_v62 }
 0x647   :  { %v1276_v44 = vpop.f32.mrf.mxu1  ;;  %v1921_v15 = vsel %vm614_vm3, %v1786_v18, %v1780_v19 }
 0x648   :  { %1373 = vtanh.f32 %v790_v43  ;;  %v1212_v57 = vmul.f32 -1.442695, %v790_v43 }
 0x649   :  { %v786_v48 = vpop.f32.mrf.mxu1 }
 0x64a   :  { %v791_v49 = vadd.f32 %v1210_v47, %v786_v48 }
 0x64b   :  { %v1277_v50 = vpop.f32.mrf.mxu1 }
 0x64c   :  { %1375 = vtanh.f32 %v791_v49  ;;  %v1213_v59 = vmul.f32 -1.442695, %v791_v49 }
 0x64d   :  { %1377 = vpow2.f32 %v1205_v55 }
 0x64e   :  { %1379 = vpow2.f32 %v1206_v56 }
 0x64f   :  { %v1370_v51 = vpop.eup %1369  ;;  %1381 = vpow2.f32 %v1212_v57 }
 0x650   :  { %690 = vrot.lane.b32.xlu1 %v1370_v51, %s1458_s7  ;;  %1383 = vpow2.f32 %v1213_v59 }
 0x653   :  { %v1372_v52 = vpop.eup %1371 }
 0x654   :  { %692 = vrot.lane.b32.xlu0 %v1372_v52, %s1458_s7 }
 0x655   :  { %v1374_v53 = vpop.eup %1373 }
 0x656   :  { %810 = vrot.lane.b32.xlu1 %v1374_v53, %s1458_s7 }
 0x659   :  { %v1376_v54 = vpop.eup %1375 }
 0x65a   :  { %812 = vrot.lane.b32.xlu0 %v1376_v54, %s1458_s7  ;;  %v1378_v60 = vpop.eup %1377 }
 0x65b   :  { %v678_v63 = vadd.f32 1.0, %v1378_v60  ;;  %v1380_v29 = vpop.eup %1379 }
 0x65c   :  { %v1382_v6 = vpop.eup %1381  ;;  %v679_v10 = vadd.f32 1.0, %v1380_v29 }
 0x65d   :  { %1385 = vrcp.f32 %v678_v63  ;;  %v1384_v30 = vpop.eup %1383  ;;  %v798_v11 = vadd.f32 1.0, %v1382_v6 }
 0x65e   :  { %1387 = vrcp.f32 %v679_v10  ;;  %v799_v8 = vadd.f32 1.0, %v1384_v30 }
 0x65f   :  { %1389 = vrcp.f32 %v798_v11 }
 0x660   :  { %1391 = vrcp.f32 %v799_v8 }
 0x66a   :  { %v1858_v12 = vpop.eup %1385 }
 0x66b   :  { %v1862_v16 = vpop.eup %1387  ;;  %v686_v2 = vmul.f32 %v1858_v12, %v1891_v40 }
 0x66c   :  { %v1868_v23 = vpop.eup %1389  ;;  %v687_v43 = vmul.f32 %v1862_v16, %v1901_v1 }
 0x66d   :  { %v1392_v35 = vpop.eup %1391  ;;  %v806_v44 = vmul.f32 %v1868_v23, %v1910_v58 }
 0x66e   :  { %v807_v4 = vmul.f32 %v1392_v35, %v1921_v15 }
 0x6c2   :  { %v691_v32 = vpop.permute.xlu1 %690 }
 0x6c3   :  { %v696_v13 = vmul.f32 %v1858_v12, %v691_v32 }
 0x6c5   :  { %700 = vrot.lane.b32.xlu1 %v696_v13, %s1459_s8 }
 0x6c6   :  { %v693_v17 = vpop.permute.xlu0 %692 }
 0x6c7   :  { %v697_v20 = vmul.f32 %v1862_v16, %v693_v17 }
 0x6c8   :  { %v811_v27 = vpop.permute.xlu1 %810 }
 0x6c9   :  { %702 = vrot.lane.b32.xlu0 %v697_v20, %s1459_s8  ;;  %v816_v31 = vmul.f32 %v1868_v23, %v811_v27 }
 0x6cb   :  { %820 = vrot.lane.b32.xlu1 %v816_v31, %s1459_s8  ;;  %v980_v31 = vld [vmem:[%s2083_s1 + $0x8] sm:$0xff] }
 0x6cc   :  { %v813_v36 = vpop.permute.xlu0 %812 }
 0x6cd   :  { %v817_v45 = vmul.f32 %v1392_v35, %v813_v36 }
 0x6cf   :  { %822 = vrot.lane.b32.xlu0 %v817_v45, %s1459_s8  ;;  %728 = vperm.xlu1 %1302, %v725_v46  }
 0x6d3   :  { %731 = vperm.xlu0 %1301, %v726_v37   ;;  %848 = vperm.xlu1 %1302, %v845_v39  }
 0x6d7   :  { %851 = vperm.xlu0 %1301, %v846_v0  }
 0x737   :  { %v701_v41 = vpop.permute.xlu1 %700 }
 0x738   :  { %v1895_v42 = vadd.f32 %v701_v41, %v686_v2 }
 0x73a   :  { %1393 = vtanh.f32 %v1895_v42 }
 0x73b   :  { %v703_v22 = vpop.permute.xlu0 %702 }
 0x73c   :  { %v1912_v61 = vadd.f32 %v703_v22, %v687_v43 }
 0x73d   :  { %v821_v62 = vpop.permute.xlu1 %820 }
 0x73e   :  { %1395 = vtanh.f32 %v1912_v61  ;;  %v1923_v14 = vadd.f32 %v821_v62, %v806_v44 }
 0x740   :  { %1397 = vtanh.f32 %v1923_v14 }
 0x741   :  { %v823_v9 = vpop.permute.xlu0 %822 }
 0x742   :  { %v1927_v28 = vadd.f32 %v823_v9, %v807_v4 }
 0x744   :  { %1399 = vtanh.f32 %v1927_v28 }
 0x747   :  { %v1394_v47 = vpop.eup %1393 }
 0x748   :  { %712 = vrot.lane.b32.xlu1 %v1394_v47, %s1459_s8 }
 0x74a   :  { %v1934_v18 = vpop.permute.xlu1 %728 }
 0x74b   :  { %v1396_v48 = vpop.eup %1395  ;;  %vm733_vm7 = vcmp.eq.s32.totalorder %v1934_v18, 1 }
 0x74c   :  { %714 = vrot.lane.b32.xlu0 %v1396_v48, %s1459_s8 }
 0x74d   :  { %v1398_v3 = vpop.eup %1397 }
 0x74e   :  { %832 = vrot.lane.b32.xlu1 %v1398_v3, %s1459_s8  ;;  %v1936_v49 = vpop.permute.xlu0 %731  ;;  %v1938_v50 = vpop.permute.xlu1 %848 }
 0x74f   :  { %vm734_vm8 = vcmp.eq.s32.totalorder %v1936_v49, 1  ;;  %vm853_vm9 = vcmp.eq.s32.totalorder %v1938_v50, 1 }
 0x751   :  { %v1400_v19 = vpop.eup %1399 }
 0x752   :  { %834 = vrot.lane.b32.xlu0 %v1400_v19, %s1459_s8  ;;  %v1940_v51 = vpop.permute.xlu0 %851 }
 0x753   :  { %vm854_vm10 = vcmp.eq.s32.totalorder %v1940_v51, 1 }
 0x754   :  { %v858_v49 = vsel %vm854_vm10, %v1927_v28, %v1921_v15 }
 0x7ba   :  { %v713_v52 = vpop.permute.xlu1 %712 }
 0x7bb   :  { %v718_v53 = vmul.f32 %v1858_v12, %v713_v52 }
 0x7bd   :  { %v1949_v57 = vsel %vm733_vm7, %v718_v53, %v1808_v24 }
 0x7be   :  { %v715_v54 = vpop.permute.xlu0 %714 }
 0x7bf   :  { %v719_v55 = vmul.f32 %v1862_v16, %v715_v54  ;;  %v979_v16 = vld [vmem:[%s2083_s1] sm:$0xff] }
 0x7c0   :  { %v833_v56 = vpop.permute.xlu1 %832 }
 0x7c1   :  { %v1954_v59 = vsel %vm734_vm8, %v719_v55, %v1813_v26  ;;  %v838_v63 = vmul.f32 %v1868_v23, %v833_v56  ;;  %v1221_v55 = vld [vmem:[%s2084_s2 + $0x30] sm:$0xff] }
 0x7c2   :  { %v862_v60 = vpack.c.bf16 %v1954_v59, %v1949_v57  ;;  %vm963_vm11 = vcmp.gt.f32.partialorder %v1221_v55, 0.5 }
 0x7c3   :  { %v1965_v24 = vsel %vm853_vm9, %v838_v63, %v1824_v7  ;;  %v1216_v7 = vld [vmem:[%s2082_s0 + $0x30] sm:$0xff] }
 0x7c4   :  { %864 = vrot.lane.b32.xlu1 %v862_v60, %s1461_s18  ;;  %v835_v29 = vpop.permute.xlu0 %834 }
 0x7c5   :  { %v839_v6 = vmul.f32 %v1392_v35, %v835_v29  ;;  %v1222_v29 = vld [vmem:[%s2084_s2 + $0x38] sm:$0xff]  ;;  %s1462_s2 = smov 112  }
 0x7c6   :  { %vm964_vm12 = vcmp.gt.f32.partialorder %v1222_v29, 0.5 }
 0x7c7   :  { %v1970_v26 = vsel %vm854_vm10, %v839_v6, %v1829_v38  ;;  %v1217_v38 = vld [vmem:[%s2082_s0 + $0x38] sm:$0xff]  ;;  %v1079_v6 = vld [vmem:[%s2085_s3] sm:$0xff] }
 0x7c8   :  { %v981_v10 = vpack.c.bf16 %v1970_v26, %v1965_v24  ;;  %vm1081_vm13 = vcmp.gt.f32.partialorder %v1079_v6, 0.5 }
 0x7ca   :  { %983 = vrot.lane.b32.xlu0 %v981_v10, %s1461_s18 }
 0x836   :  { %v865_v30 = vpop.permute.xlu1 %864 }
 0x837   :  { %1281 = vmatmul.mubr.msk.bf16.vlgmr.msra.gmra.mxu0 %vm79_vm1, %v865_v30 }
 0x83c   :  { %v984_v11 = vpop.permute.xlu0 %983 }
 0x83d   :  { %1287 = vmatmul.mubr.msk.bf16.vlgmr.msra.gmra.mxu1 %vm79_vm1, %v984_v11 }
 0x8f7   :  { %v903_v8 = vpop.f32.mrf.mxu0 }
 0x8f8   :  { %v910_v12 = vadd.f32 %v1216_v7, %v903_v8  ;;  %v965_v7 = vsel %vm963_vm11, 1, %v1457_v25  ;;  %v1080_v8 = vld [vmem:[%s2085_s3 + $0x8] sm:$0xff]  ;;  %s1463_s3 = smov [#allocation4]  }
 0x8f9   :  { %v1282_v32 = vpop.f32.mrf.mxu0  ;;  %vm1082_vm14 = vcmp.gt.f32.partialorder %v1080_v8, 0.5 }
 0x8fa   :  { %1401 = vtanh.f32 %v910_v12  ;;  %v1219_v37 = vmul.f32 -1.442695, %v910_v12  ;;  %v966_v12 = vsel %vm964_vm12, 1, %v1457_v25  ;;  %v1083_v32 = vsel %vm1081_vm13, 1, %v1457_v25 }
 0x8fb   :  { %v906_v13 = vpop.f32.mrf.mxu0 }
 0x8fc   :  { %v911_v17 = vadd.f32 %v1217_v38, %v906_v13  ;;  %v1084_v38 = vsel %vm1082_vm14, 1, %v1457_v25  ;;  %v737_v13 = vsel %vm733_vm7, %v1895_v42, %v1891_v40  ;;  %v857_v25 = vsel %vm853_vm9, %v1923_v14, %v1910_v58 }
 0x8fd   :  { %v1283_v20 = vpop.f32.mrf.mxu0  ;;  %v1022_v21 = vpop.f32.mrf.mxu1 }
 0x8fe   :  { %1403 = vtanh.f32 %v911_v17  ;;  %v1029_v23 = vadd.f32 %v1022_v21, %v979_v16  ;;  %v1220_v39 = vmul.f32 -1.442695, %v911_v17  ;;  %v738_v21 = vsel %vm734_vm8, %v1912_v61, %v1901_v1 }
 0x8ff   :  { %v1288_v27 = vpop.f32.mrf.mxu1 }
 0x900   :  { %1405 = vtanh.f32 %v1029_v23  ;;  %v1224_v0 = vmul.f32 -1.442695, %v1029_v23 }
 0x901   :  { %v1025_v33 = vpop.f32.mrf.mxu1 }
 0x902   :  { %v1030_v34 = vadd.f32 %v1025_v33, %v980_v31 }
 0x903   :  { %v1289_v35 = vpop.f32.mrf.mxu1 }
 0x904   :  { %1407 = vtanh.f32 %v1030_v34  ;;  %v1225_v2 = vmul.f32 -1.442695, %v1030_v34 }
 0x905   :  { %1409 = vpow2.f32 %v1219_v37 }
 0x906   :  { %1411 = vpow2.f32 %v1220_v39 }
 0x907   :  { %v1402_v36 = vpop.eup %1401  ;;  %1413 = vpow2.f32 %v1224_v0 }
 0x908   :  { %930 = vrot.lane.b32.xlu1 %v1402_v36, %s1458_s7  ;;  %1415 = vpow2.f32 %v1225_v2 }
 0x90b   :  { %v1404_v45 = vpop.eup %1403 }
 0x90c   :  { %932 = vrot.lane.b32.xlu0 %v1404_v45, %s1458_s7 }
 0x90d   :  { %v1406_v46 = vpop.eup %1405 }
 0x90e   :  { %1049 = vrot.lane.b32.xlu1 %v1406_v46, %s1458_s7 }
 0x911   :  { %v1408_v5 = vpop.eup %1407 }
 0x912   :  { %1051 = vrot.lane.b32.xlu0 %v1408_v5, %s1458_s7  ;;  %v1410_v41 = vpop.eup %1409 }
 0x913   :  { %v918_v43 = vadd.f32 1.0, %v1410_v41  ;;  %v1412_v22 = vpop.eup %1411 }
 0x914   :  { %v1414_v44 = vpop.eup %1413  ;;  %v919_v62 = vadd.f32 1.0, %v1412_v22 }
 0x915   :  { %1417 = vrcp.f32 %v918_v43  ;;  %v1416_v4 = vpop.eup %1415  ;;  %v1037_v9 = vadd.f32 1.0, %v1414_v44 }
 0x916   :  { %1419 = vrcp.f32 %v919_v62  ;;  %v1038_v47 = vadd.f32 1.0, %v1416_v4 }
 0x917   :  { %1421 = vrcp.f32 %v1037_v9 }
 0x918   :  { %1423 = vrcp.f32 %v1038_v47 }
 0x922   :  { %v1993_v48 = vpop.eup %1417 }
 0x923   :  { %v1997_v52 = vpop.eup %1419  ;;  %v926_v16 = vmul.f32 %v1993_v48, %v737_v13 }
 0x924   :  { %v2003_v56 = vpop.eup %1421  ;;  %v927_v23 = vmul.f32 %v1997_v52, %v738_v21 }
 0x925   :  { %v2013_v10 = vpop.eup %1423  ;;  %v1045_v40 = vmul.f32 %v2003_v56, %v857_v25 }
 0x926   :  { %v1046_v61 = vmul.f32 %v2013_v10, %v858_v49 }
 0x97a   :  { %v931_v3 = vpop.permute.xlu1 %930 }
 0x97b   :  { %v936_v19 = vmul.f32 %v1993_v48, %v931_v3 }
 0x97d   :  { %940 = vrot.lane.b32.xlu1 %v936_v19, %s1459_s8 }
 0x97e   :  { %v933_v53 = vpop.permute.xlu0 %932 }
 0x97f   :  { %v937_v54 = vmul.f32 %v1997_v52, %v933_v53 }
 0x980   :  { %v1050_v60 = vpop.permute.xlu1 %1049 }
 0x981   :  { %942 = vrot.lane.b32.xlu0 %v937_v54, %s1459_s8  ;;  %v1055_v63 = vmul.f32 %v2003_v56, %v1050_v60 }
 0x983   :  { %1059 = vrot.lane.b32.xlu1 %v1055_v63, %s1459_s8 }
 0x984   :  { %v1052_v30 = vpop.permute.xlu0 %1051 }
 0x985   :  { %v1056_v11 = vmul.f32 %v2013_v10, %v1052_v30 }
 0x987   :  { %1061 = vrot.lane.b32.xlu0 %v1056_v11, %s1459_s8  ;;  %968 = vperm.xlu1 %1302, %v965_v7  }
 0x98b   :  { %971 = vperm.xlu0 %1301, %v966_v12   ;;  %1086 = vperm.xlu1 %1302, %v1083_v32  }
 0x98f   :  { %1089 = vperm.xlu0 %1301, %v1084_v38  }
 0x9ef   :  { %v941_v17 = vpop.permute.xlu1 %940 }
 0x9f0   :  { %v946_v20 = vadd.f32 %v941_v17, %v926_v16 }
 0x9f2   :  { %1425 = vtanh.f32 %v946_v20 }
 0x9f3   :  { %v943_v27 = vpop.permute.xlu0 %942 }
 0x9f4   :  { %v947_v18 = vadd.f32 %v943_v27, %v927_v23 }
 0x9f5   :  { %v1060_v42 = vpop.permute.xlu1 %1059 }
 0x9f6   :  { %1427 = vtanh.f32 %v947_v18  ;;  %v1065_v1 = vadd.f32 %v1060_v42, %v1045_v40 }
 0x9f8   :  { %1429 = vtanh.f32 %v1065_v1 }
 0x9f9   :  { %v1062_v31 = vpop.permute.xlu0 %1061 }
 0x9fa   :  { %v1066_v33 = vadd.f32 %v1062_v31, %v1046_v61 }
 0x9fc   :  { %1431 = vtanh.f32 %v1066_v33 }
 0x9ff   :  { %v1426_v34 = vpop.eup %1425 }
 0xa00   :  { %952 = vrot.lane.b32.xlu1 %v1426_v34, %s1459_s8 }
 0xa02   :  { %v969_v14 = vpop.permute.xlu1 %968 }
 0xa03   :  { %v1428_v58 = vpop.eup %1427  ;;  %vm973_vm15 = vcmp.eq.s32.totalorder %v969_v14, 1 }
 0xa04   :  { %954 = vrot.lane.b32.xlu0 %v1428_v58, %s1459_s8  ;;  %v977_v28 = vsel %vm973_vm15, %v946_v20, %v737_v13 }
 0xa05   :  { %v1430_v50 = vpop.eup %1429 }
 0xa06   :  { %1071 = vrot.lane.b32.xlu1 %v1430_v50, %s1459_s8  ;;  %v972_v51 = vpop.permute.xlu0 %971  ;;  %v1087_v36 = vpop.permute.xlu1 %1086 }
 0xa07   :  { %vm974_vm2 = vcmp.eq.s32.totalorder %v972_v51, 1  ;;  %vm1091_vm3 = vcmp.eq.s32.totalorder %v1087_v36, 1 }
 0xa08   :  { %v978_v35 = vsel %vm974_vm2, %v947_v18, %v738_v21  ;;  %v1095_v9 = vsel %vm1091_vm3, %v1065_v1, %v857_v25 }
 0xa09   :  { %v1432_v15 = vpop.eup %1431 }
 0xa0a   :  { %1073 = vrot.lane.b32.xlu0 %v1432_v15, %s1459_s8  ;;  %1109 = vrot.lane.b32.xlu1 %v977_v28, %s1462_s2  ;;  %v1090_v45 = vpop.permute.xlu0 %1089  ;;  %s1153_s8 = sshll.u32 %s1463_s3, 4  ;;  %s1154_s8 = int_to_ptr.vmem [resolvable:$true] %s1153_s8 }
 0xa0b   :  { %vm1092_vm0 = vcmp.eq.s32.totalorder %v1090_v45, 1  ;;  %p1438_p1 = scmp.lt.s32.totalorder %s1154_s8, %s1154_s8 }
 0xa0e   :  { %1111 = vrot.lane.b32.xlu0 %v978_v35, %s1462_s2 }
 0xa72   :  { %v953_v46 = vpop.permute.xlu1 %952 }
 0xa73   :  { %v958_v5 = vmul.f32 %v1993_v48, %v953_v46 }
 0xa75   :  { %v975_v37 = vsel %vm973_vm15, %v958_v5, %v1949_v57 }
 0xa76   :  { %1099 = vrot.lane.b32.xlu1 %v975_v37, %s1461_s18  ;;  %v955_v39 = vpop.permute.xlu0 %954 }
 0xa77   :  { %v959_v0 = vmul.f32 %v1997_v52, %v955_v39 }
 0xa78   :  { %v1072_v2 = vpop.permute.xlu1 %1071 }
 0xa79   :  { %v976_v41 = vsel %vm974_vm2, %v959_v0, %v1954_v59  ;;  %v1077_v43 = vmul.f32 %v2003_v56, %v1072_v2 }
 0xa7a   :  { %1101 = vrot.lane.b32.xlu0 %v976_v41, %s1461_s18 }
 0xa7b   :  { %v1093_v22 = vsel %vm1091_vm3, %v1077_v43, %v1965_v24  ;;  %v1096_v24 = vsel %vm1092_vm0, %v1066_v33, %v858_v49 }
 0xa7c   :  { %v1074_v44 = vpop.permute.xlu0 %1073  ;;  %1139 = vrot.lane.b32.xlu1 %v1093_v22, %s1462_s2  ;;  %v1110_v57 = vpop.permute.xlu1 %1109 }
 0xa7d   :  { %v1078_v62 = vmul.f32 %v2013_v10, %v1074_v44  ;;  %1115 = vst.msk [vmem:[#allocation3] sm:$0xff] %vm79_vm1, %v1110_v57 }
 0xa7f   :  { %v1094_v4 = vsel %vm1092_vm0, %v1078_v62, %v1970_v26 }
 0xa80   :  { %1141 = vrot.lane.b32.xlu0 %v1094_v4, %s1462_s2  ;;  %v1112_v59 = vpop.permute.xlu0 %1111  ;;  %1119 = vrot.lane.b32.xlu1 %v1093_v22, %s1461_s18 }
 0xa81   :  { %1116 = vst.msk [vmem:[#allocation3 + $0x8] sm:$0xff] %vm79_vm1, %v1112_v59 }
 0xa84   :  { %1121 = vrot.lane.b32.xlu0 %v1094_v4, %s1461_s18  ;;  %1129 = vrot.lane.b32.xlu1 %v1095_v9, %s1462_s2  ;;  %s1433_s18 = scalar_lea.vmem %s1154_s8, 256 }
 0xa85   :  { %p1434_p0 = scmp.ne.s32.totalorder %s1154_s8, %s1433_s18  ;;  %p1439_p2 = scmp.lt.s32.totalorder %s1433_s18, %s1433_s18 }
 0xa87   :  { %p1440_p3 = por %p1439_p2, %p1438_p1 }
 0xa88   :  { %1131 = vrot.lane.b32.xlu0 %v1096_v24, %s1462_s2 }
 0xa89   :  { %p1441_p4 = pnand %p1440_p3, %p1434_p0 }
 0xae8   :  { %v1100_v47 = vpop.permute.xlu1 %1099 }
 0xae9   :  { %1105 = vst.msk [vmem:[#allocation2] sm:$0xff] %vm79_vm1, %v1100_v47  ;;  %1137 = vst.msk [vmem:[#allocation4] sm:$0xff] %vm79_vm1, %v1100_v47 }
 0xaec   :  { %v1102_v26 = vpop.permute.xlu0 %1101 }
 0xaed   :  { %1106 = vst.msk [vmem:[#allocation2 + $0x8] sm:$0xff] %vm79_vm1, %v1102_v26  ;;  %1138 = vst.msk [vmem:[#allocation4 + $0x8] sm:$0xff] %vm79_vm1, %v1102_v26 }
 0xaee   :  { %v1140_v48 = vpop.permute.xlu1 %1139 }
 0xaef   :  { %1146 = vst.msk [vmem:[#allocation4] sm:$0xff] %vm1145_vm4, %v1140_v48 }
 0xaf2   :  { %v1142_v3 = vpop.permute.xlu0 %1141  ;;  %v1120_v19 = vpop.permute.xlu1 %1119 }
 0xaf3   :  { %1147 = vst.msk [vmem:[#allocation4 + $0x8] sm:$0xff] %vm1145_vm4, %v1142_v3 }
 0xaf4   :  { %1125 = vst.msk [vmem:[#allocation2 + $0x10] sm:$0xff] %vm79_vm1, %v1120_v19 }
 0xaf5   :  { %1444 = shalt.err (!%p1441_p4)
}
 0xaf6   :  { %s1464_s17 = smov 128   ;;  %s1465_s19 = smov 8   ;;  %v1122_v52 = vpop.permute.xlu0 %1121  ;;  %v1130_v53 = vpop.permute.xlu1 %1129 }
 0xaf7   :  { %1159 = dma.vmem_to_hbm [thread:$0]  %s1154_s8, 256, %s2088_s6, [#allocation5], %s1464_s17, %s1464_s17, %s1465_s19   ;;  %1126 = vst.msk [vmem:[#allocation2 + $0x18] sm:$0xff] %vm79_vm1, %v1122_v52  ;;  %1135 = vst.msk [vmem:[#allocation3 + $0x10] sm:$0xff] %vm79_vm1, %v1130_v53 }
 0xafa   :  { %v1132_v54 = vpop.permute.xlu0 %1131 }
 0xafb   :  { %1136 = vst.msk [vmem:[#allocation3 + $0x18] sm:$0xff] %vm79_vm1, %v1132_v54 }
 0xafc   :  { %1453 = dma.done.wait [#allocation5], 256  }
 0xafd   :  { %1454 = vsyncadd [#allocation5], 4294967040 }
 0xafe   :  { %1163 = vsyncpa [#allocation5], 1 }

</bundles_post_ra>
